<compile_context>
chip_gen: v6e
topology: v6e:2x2x1
jax: 0.10.0
libtpu: 0.0.40
codegen_flags: <defaults>
</compile_context>

<pallas_src>
import functools

import jax
import jax.numpy as jnp
from jax.experimental import pallas as pl
from jax.experimental.pallas import tpu as pltpu


def _taylor_kernel(x_ref, w1_ref, b1_ref, w2_ref, b2_ref,
                   w3_ref, b3_ref, w4_ref, b4_ref, o_ref, *, compute_dtype):
    """Fused forward for one batch tile (batch = lane dim), weights resident.

    Shapes (TB = batch tile, lane dim):
      x_ref  : (8, TB)            w1: (128, 8)    b1: (128, 1)
      layer2 : (256, TB)          w2: (256, 128)  b2: (256, 1)
      layer3 : (128, TB)          w3: (128, 256)  b3: (128, 1)
      o_ref  : (out_dim, TB)      w4: (out_dim, 128)  b4: (out_dim, 1)
    """
    # ---- layer 1 on the VPU: K=8 contraction as 8 unrolled broadcast-FMAs ----
    # (MXU would pad K=8 to its full contraction depth: ~20% of the pushes for
    #  ~1.5% of the FLOPs.  VPU has slack; done in f32 for free extra precision.)
    x32 = x_ref[...].astype(jnp.float32)                     # (8, TB)
    w1 = w1_ref[...].astype(jnp.float32)                     # (128, 8)
    h = b1_ref[...] + w1[:, 0:1] * x32[0:1, :]               # (128, TB)
    for k in range(1, 8):
        h = h + w1[:, k:k + 1] * x32[k:k + 1, :]
    h = jnp.maximum(h, 0.0)

    # ---- layers 2-4 on the MXU (bf16 inputs by default, f32 accumulation) ----
    h = jnp.dot(w2_ref[...], h.astype(compute_dtype),
                preferred_element_type=jnp.float32)           # (256, TB)
    h = jnp.maximum(h + b2_ref[...], 0.0)

    h = jnp.dot(w3_ref[...], h.astype(compute_dtype),
                preferred_element_type=jnp.float32)           # (128, TB)
    h = jnp.maximum(h + b3_ref[...], 0.0)

    h = jnp.dot(w4_ref[...], h.astype(compute_dtype),
                preferred_element_type=jnp.float32)           # (out_dim, TB)
    o_ref[...] = (h + b4_ref[...]).astype(o_ref.dtype)


def _round_up(n, m):
    return int(pl.cdiv(n, m)) * m


def taylor_nn_forward(x, params, *, tile_b=None, use_bf16=True,
                      vmem_limit_bytes=None):
    """x: (B, 8) float32.  params: PyTorch-layout weights (out,in), biases (out,1).

    Returns (B, function_amount*2) float32.
    """
    B, D_in = x.shape
    assert D_in == 8
    out_dim = params["w4"].shape[0]

    # ---- batch-tile (lane dim) selection -------------------------------------
    if tile_b is None:
        if B <= 2048:
            # >= 2 lane-aligned grid steps when possible -> both v7x TensorCores.
            tile_b = _round_up(pl.cdiv(B, 2), 128)
        else:
            # Large batches: 2048-column tiles amortize per-step overhead while
            # staying well within v7x's 64 MiB VMEM / v5e's 16 MiB scoped default.
            tile_b = 2048
    else:
        tile_b = _round_up(max(tile_b, 1), 128)
    # Blocks never exceed the batch; a block equal to the full dim is always legal.
    if tile_b >= B:
        tile_b = B
    grid = (int(pl.cdiv(B, tile_b)),)

    compute_dtype = jnp.bfloat16 if use_bf16 else jnp.float32

    # Transpose so batch is the lane (last) dim; cast x / MXU weights to bf16
    # wrapper-side (halves their HBM->VMEM traffic).  w1 stays f32 (VPU layer).
    x_t = x.astype(compute_dtype).T                           # (8, B)
    w1, b1 = params["w1"], params["b1"]
    w2, b2 = params["w2"].astype(compute_dtype), params["b2"]
    w3, b3 = params["w3"].astype(compute_dtype), params["b3"]
    w4, b4 = params["w4"].astype(compute_dtype), params["b4"]

    # Weights/biases: full-array blocks with constant index_map -> fetched once
    # and kept resident in VMEM across all batch tiles (~200-300 KB total).
    def resident(arr):
        return pl.BlockSpec(arr.shape, lambda i: (0, 0))

    flops = 2 * B * (8 * 128 + 128 * 256 + 256 * 128 + 128 * out_dim)
    operands = (x_t, w1, b1, w2, b2, w3, b3, w4, b4)
    bytes_accessed = sum(int(a.size) * a.dtype.itemsize for a in operands)
    bytes_accessed += B * out_dim * 4
    cost = pl.CostEstimate(flops=flops, transcendentals=0,
                           bytes_accessed=bytes_accessed)

    kernel = functools.partial(_taylor_kernel, compute_dtype=compute_dtype)

    out_t = pl.pallas_call(
        kernel,
        out_shape=jax.ShapeDtypeStruct((out_dim, B), jnp.float32),
        grid_spec=pltpu.PrefetchScalarGridSpec(
            num_scalar_prefetch=0,
            grid=grid,
            in_specs=[
                pl.BlockSpec((D_in, tile_b), lambda i: (0, i)),
                resident(w1), resident(b1),
                resident(w2), resident(b2),
                resident(w3), resident(b3),
                resident(w4), resident(b4),
            ],
            out_specs=pl.BlockSpec((out_dim, tile_b), lambda i: (0, i)),
        ),
        compiler_params=pltpu.CompilerParams(
            dimension_semantics=("parallel",),
            vmem_limit_bytes=vmem_limit_bytes,
        ),
        cost_estimate=cost,
    )(*operands)

    return out_t.T                                            # (B, out_dim) f32


def init_params(key, function_amount):
    """PyTorch nn.Linear-style init (uniform +/-1/sqrt(fan_in)).
    Weights in native (out_features, in_features) layout; biases (out, 1)."""
    dims = [(128, 8), (256, 128), (128, 256), (function_amount * 2, 128)]
    params = {}
    for idx, (fan_out, fan_in) in enumerate(dims, start=1):
        key, kw, kb = jax.random.split(key, 3)
        bound = 1.0 / (fan_in ** 0.5)
        params[f"w{idx}"] = jax.random.uniform(
            kw, (fan_out, fan_in), jnp.float32, minval=-bound, maxval=bound)
        params[f"b{idx}"] = jax.random.uniform(
            kb, (fan_out, 1), jnp.float32, minval=-bound, maxval=bound)
    return params


def reference_forward(x, params):
    h = jnp.maximum(x @ params["w1"].T + params["b1"].T, 0.0)
    h = jnp.maximum(h @ params["w2"].T + params["b2"].T, 0.0)
    h = jnp.maximum(h @ params["w3"].T + params["b3"].T, 0.0)
    return h @ params["w4"].T + params["b4"].T


if __name__ == "__main__":
    key = jax.random.PRNGKey(0)
    function_amount = 4          # output dim = function_amount * 2 = 8

    key, kp = jax.random.split(key)
    params = init_params(kp, function_amount)

    # --- test 1: small batch, single grid step, f32 path (tight check) -------
    batch = 16
    key, kx = jax.random.split(key)
    x = jax.random.normal(kx, (batch, 8), jnp.float32)
    out = jax.block_until_ready(taylor_nn_forward(x, params, use_bf16=False))
    ref = reference_forward(x, params)
    assert out.shape == (batch, function_amount * 2)
    assert jnp.allclose(out, ref, atol=1e-4, rtol=1e-4)

    # --- test 2: ragged batch, multi-step parallel grid + masked edge block ---
    batch2 = 200
    key, kx2 = jax.random.split(key)
    x2 = jax.random.normal(kx2, (batch2, 8), jnp.float32)
    out2 = jax.block_until_ready(
        taylor_nn_forward(x2, params, tile_b=128, use_bf16=False))
    ref2 = reference_forward(x2, params)
    assert out2.shape == (batch2, function_amount * 2)
    assert jnp.allclose(out2, ref2, atol=1e-4, rtol=1e-4)

    # --- test 3: default perf path (bf16 MXU inputs, f32 accumulation) --------
    out3 = jax.block_until_ready(taylor_nn_forward(x, params))
    assert out3.shape == (batch, function_amount * 2)
    assert jnp.allclose(out3, ref, atol=1e-1, rtol=5e-2)

    print("KERNEL_OK")
</pallas_src>

<mosaic_0001>
module attributes {stable_mosaic.version = 11 : i64} {
  func.func @_taylor_kernel(%arg0: i32, %arg1: memref<8x16xf32, #tpu.memory_space<vmem>>, %arg2: memref<128x8xf32, #tpu.memory_space<vmem>>, %arg3: memref<128x1xf32, #tpu.memory_space<vmem>>, %arg4: memref<256x128xf32, #tpu.memory_space<vmem>>, %arg5: memref<256x1xf32, #tpu.memory_space<vmem>>, %arg6: memref<128x256xf32, #tpu.memory_space<vmem>>, %arg7: memref<128x1xf32, #tpu.memory_space<vmem>>, %arg8: memref<8x128xf32, #tpu.memory_space<vmem>>, %arg9: memref<8x1xf32, #tpu.memory_space<vmem>>, %arg10: memref<8x16xf32, #tpu.memory_space<vmem>>) attributes {dimension_semantics = [#tpu.dimension_semantics<parallel>], iteration_bounds = array<i64: 1>, scalar_prefetch = 0 : i64, scratch_operands = 0 : i64, tpu.core_type = #tpu.core_type<tc>, window_params = [{transform_indices = @transform_0, window_bounds = array<i64: 8, 16>}, {pipeline_mode = #tpu.pipeline_mode<synchronous>, transform_indices = @transform_1, window_bounds = array<i64: 128, 8>}, {pipeline_mode = #tpu.pipeline_mode<synchronous>, transform_indices = @transform_2, window_bounds = array<i64: 128, 1>}, {pipeline_mode = #tpu.pipeline_mode<synchronous>, transform_indices = @transform_3, window_bounds = array<i64: 256, 128>}, {pipeline_mode = #tpu.pipeline_mode<synchronous>, transform_indices = @transform_4, window_bounds = array<i64: 256, 1>}, {pipeline_mode = #tpu.pipeline_mode<synchronous>, transform_indices = @transform_5, window_bounds = array<i64: 128, 256>}, {pipeline_mode = #tpu.pipeline_mode<synchronous>, transform_indices = @transform_6, window_bounds = array<i64: 128, 1>}, {pipeline_mode = #tpu.pipeline_mode<synchronous>, transform_indices = @transform_7, window_bounds = array<i64: 8, 128>}, {pipeline_mode = #tpu.pipeline_mode<synchronous>, transform_indices = @transform_8, window_bounds = array<i64: 8, 1>}, {transform_indices = @transform_9, window_bounds = array<i64: 8, 16>}]} {
    %c0 = arith.constant 0 : index
    %c0_0 = arith.constant 0 : index
    %0 = vector.load %arg1[%c0, %c0_0] : memref<8x16xf32, #tpu.memory_space<vmem>>, vector<8x16xf32>
    %c0_1 = arith.constant 0 : index
    %c0_2 = arith.constant 0 : index
    %1 = vector.load %arg2[%c0_1, %c0_2] : memref<128x8xf32, #tpu.memory_space<vmem>>, vector<128x8xf32>
    %c0_3 = arith.constant 0 : index
    %c0_4 = arith.constant 0 : index
    %2 = vector.load %arg3[%c0_3, %c0_4] : memref<128x1xf32, #tpu.memory_space<vmem>>, vector<128x1xf32>
    %3 = vector.extract_strided_slice %1 {offsets = [0, 0], sizes = [128, 1], strides = [1, 1]} : vector<128x8xf32> to vector<128x1xf32>
    %4 = vector.extract_strided_slice %0 {offsets = [0, 0], sizes = [1, 16], strides = [1, 1]} : vector<8x16xf32> to vector<1x16xf32>
    %5 = vector.broadcast %3 : vector<128x1xf32> to vector<128x16xf32>
    %6 = vector.broadcast %4 : vector<1x16xf32> to vector<128x16xf32>
    %7 = arith.mulf %5, %6 : vector<128x16xf32>
    %8 = vector.broadcast %2 : vector<128x1xf32> to vector<128x16xf32>
    %9 = arith.addf %8, %7 : vector<128x16xf32>
    %10 = vector.extract_strided_slice %1 {offsets = [0, 1], sizes = [128, 1], strides = [1, 1]} : vector<128x8xf32> to vector<128x1xf32>
    %11 = vector.extract_strided_slice %0 {offsets = [1, 0], sizes = [1, 16], strides = [1, 1]} : vector<8x16xf32> to vector<1x16xf32>
    %12 = vector.broadcast %10 : vector<128x1xf32> to vector<128x16xf32>
    %13 = vector.broadcast %11 : vector<1x16xf32> to vector<128x16xf32>
    %14 = arith.mulf %12, %13 : vector<128x16xf32>
    %15 = arith.addf %9, %14 : vector<128x16xf32>
    %16 = vector.extract_strided_slice %1 {offsets = [0, 2], sizes = [128, 1], strides = [1, 1]} : vector<128x8xf32> to vector<128x1xf32>
    %17 = vector.extract_strided_slice %0 {offsets = [2, 0], sizes = [1, 16], strides = [1, 1]} : vector<8x16xf32> to vector<1x16xf32>
    %18 = vector.broadcast %16 : vector<128x1xf32> to vector<128x16xf32>
    %19 = vector.broadcast %17 : vector<1x16xf32> to vector<128x16xf32>
    %20 = arith.mulf %18, %19 : vector<128x16xf32>
    %21 = arith.addf %15, %20 : vector<128x16xf32>
    %22 = vector.extract_strided_slice %1 {offsets = [0, 3], sizes = [128, 1], strides = [1, 1]} : vector<128x8xf32> to vector<128x1xf32>
    %23 = vector.extract_strided_slice %0 {offsets = [3, 0], sizes = [1, 16], strides = [1, 1]} : vector<8x16xf32> to vector<1x16xf32>
    %24 = vector.broadcast %22 : vector<128x1xf32> to vector<128x16xf32>
    %25 = vector.broadcast %23 : vector<1x16xf32> to vector<128x16xf32>
    %26 = arith.mulf %24, %25 : vector<128x16xf32>
    %27 = arith.addf %21, %26 : vector<128x16xf32>
    %28 = vector.extract_strided_slice %1 {offsets = [0, 4], sizes = [128, 1], strides = [1, 1]} : vector<128x8xf32> to vector<128x1xf32>
    %29 = vector.extract_strided_slice %0 {offsets = [4, 0], sizes = [1, 16], strides = [1, 1]} : vector<8x16xf32> to vector<1x16xf32>
    %30 = vector.broadcast %28 : vector<128x1xf32> to vector<128x16xf32>
    %31 = vector.broadcast %29 : vector<1x16xf32> to vector<128x16xf32>
    %32 = arith.mulf %30, %31 : vector<128x16xf32>
    %33 = arith.addf %27, %32 : vector<128x16xf32>
    %34 = vector.extract_strided_slice %1 {offsets = [0, 5], sizes = [128, 1], strides = [1, 1]} : vector<128x8xf32> to vector<128x1xf32>
    %35 = vector.extract_strided_slice %0 {offsets = [5, 0], sizes = [1, 16], strides = [1, 1]} : vector<8x16xf32> to vector<1x16xf32>
    %36 = vector.broadcast %34 : vector<128x1xf32> to vector<128x16xf32>
    %37 = vector.broadcast %35 : vector<1x16xf32> to vector<128x16xf32>
    %38 = arith.mulf %36, %37 : vector<128x16xf32>
    %39 = arith.addf %33, %38 : vector<128x16xf32>
    %40 = vector.extract_strided_slice %1 {offsets = [0, 6], sizes = [128, 1], strides = [1, 1]} : vector<128x8xf32> to vector<128x1xf32>
    %41 = vector.extract_strided_slice %0 {offsets = [6, 0], sizes = [1, 16], strides = [1, 1]} : vector<8x16xf32> to vector<1x16xf32>
    %42 = vector.broadcast %40 : vector<128x1xf32> to vector<128x16xf32>
    %43 = vector.broadcast %41 : vector<1x16xf32> to vector<128x16xf32>
    %44 = arith.mulf %42, %43 : vector<128x16xf32>
    %45 = arith.addf %39, %44 : vector<128x16xf32>
    %46 = vector.extract_strided_slice %1 {offsets = [0, 7], sizes = [128, 1], strides = [1, 1]} : vector<128x8xf32> to vector<128x1xf32>
    %47 = vector.extract_strided_slice %0 {offsets = [7, 0], sizes = [1, 16], strides = [1, 1]} : vector<8x16xf32> to vector<1x16xf32>
    %48 = vector.broadcast %46 : vector<128x1xf32> to vector<128x16xf32>
    %49 = vector.broadcast %47 : vector<1x16xf32> to vector<128x16xf32>
    %50 = arith.mulf %48, %49 : vector<128x16xf32>
    %51 = arith.addf %45, %50 : vector<128x16xf32>
    %cst = arith.constant 0.000000e+00 : f32
    %52 = vector.broadcast %cst : f32 to vector<128x16xf32>
    %53 = arith.maximumf %51, %52 : vector<128x16xf32>
    %c0_5 = arith.constant 0 : index
    %c0_6 = arith.constant 0 : index
    %54 = vector.load %arg4[%c0_5, %c0_6] : memref<256x128xf32, #tpu.memory_space<vmem>>, vector<256x128xf32>
    %cst_7 = arith.constant dense<0.000000e+00> : vector<256x16xf32>
    %55 = tpu.matmul %54, %53, %cst_7 {dimension_numbers = #tpu.dot_dimension_numbers<[1], [0], [0], [1], [0, 0, 1, 1], [], []>} : vector<256x128xf32>, vector<128x16xf32>, vector<256x16xf32> -> vector<256x16xf32>
    %c0_8 = arith.constant 0 : index
    %c0_9 = arith.constant 0 : index
    %56 = vector.load %arg5[%c0_8, %c0_9] : memref<256x1xf32, #tpu.memory_space<vmem>>, vector<256x1xf32>
    %57 = vector.broadcast %56 : vector<256x1xf32> to vector<256x16xf32>
    %58 = arith.addf %55, %57 : vector<256x16xf32>
    %cst_10 = arith.constant 0.000000e+00 : f32
    %59 = vector.broadcast %cst_10 : f32 to vector<256x16xf32>
    %60 = arith.maximumf %58, %59 : vector<256x16xf32>
    %c0_11 = arith.constant 0 : index
    %c0_12 = arith.constant 0 : index
    %61 = vector.load %arg6[%c0_11, %c0_12] : memref<128x256xf32, #tpu.memory_space<vmem>>, vector<128x256xf32>
    %cst_13 = arith.constant dense<0.000000e+00> : vector<128x16xf32>
    %62 = tpu.matmul %61, %60, %cst_13 {dimension_numbers = #tpu.dot_dimension_numbers<[1], [0], [0], [1], [0, 0, 1, 1], [], []>} : vector<128x256xf32>, vector<256x16xf32>, vector<128x16xf32> -> vector<128x16xf32>
    %c0_14 = arith.constant 0 : index
    %c0_15 = arith.constant 0 : index
    %63 = vector.load %arg7[%c0_14, %c0_15] : memref<128x1xf32, #tpu.memory_space<vmem>>, vector<128x1xf32>
    %64 = vector.broadcast %63 : vector<128x1xf32> to vector<128x16xf32>
    %65 = arith.addf %62, %64 : vector<128x16xf32>
    %cst_16 = arith.constant 0.000000e+00 : f32
    %66 = vector.broadcast %cst_16 : f32 to vector<128x16xf32>
    %67 = arith.maximumf %65, %66 : vector<128x16xf32>
    %c0_17 = arith.constant 0 : index
    %c0_18 = arith.constant 0 : index
    %68 = vector.load %arg8[%c0_17, %c0_18] : memref<8x128xf32, #tpu.memory_space<vmem>>, vector<8x128xf32>
    %cst_19 = arith.constant dense<0.000000e+00> : vector<8x16xf32>
    %69 = tpu.matmul %68, %67, %cst_19 {dimension_numbers = #tpu.dot_dimension_numbers<[1], [0], [0], [1], [0, 0, 1, 1], [], []>} : vector<8x128xf32>, vector<128x16xf32>, vector<8x16xf32> -> vector<8x16xf32>
    %c0_20 = arith.constant 0 : index
    %c0_21 = arith.constant 0 : index
    %70 = vector.load %arg9[%c0_20, %c0_21] : memref<8x1xf32, #tpu.memory_space<vmem>>, vector<8x1xf32>
    %71 = vector.broadcast %70 : vector<8x1xf32> to vector<8x16xf32>
    %72 = arith.addf %69, %71 : vector<8x16xf32>
    %c0_22 = arith.constant 0 : index
    %c0_23 = arith.constant 0 : index
    %73 = vector.load %arg10[%c0_22, %c0_23] : memref<8x16xf32, #tpu.memory_space<vmem>>, vector<8x16xf32>
    tpu.vector_store %arg10[%c0_22, %c0_23], %72 {strides = array<i32>} : memref<8x16xf32, #tpu.memory_space<vmem>>, vector<8x16xf32>,
    return
  }
  func.func @transform_0(%arg0: i32) -> (i32, i32) {
    %c0_i32 = arith.constant 0 : i32
    %c0_i32_0 = arith.constant 0 : i32
    return %c0_i32, %arg0 : i32, i32
  }
  func.func @transform_1(%arg0: i32) -> (i32, i32) {
    %c0_i32 = arith.constant 0 : i32
    %c0_i32_0 = arith.constant 0 : i32
    %c0_i32_1 = arith.constant 0 : i32
    return %c0_i32, %c0_i32_0 : i32, i32
  }
  func.func @transform_2(%arg0: i32) -> (i32, i32) {
    %c0_i32 = arith.constant 0 : i32
    %c0_i32_0 = arith.constant 0 : i32
    %c0_i32_1 = arith.constant 0 : i32
    return %c0_i32, %c0_i32_0 : i32, i32
  }
  func.func @transform_3(%arg0: i32) -> (i32, i32) {
    %c0_i32 = arith.constant 0 : i32
    %c0_i32_0 = arith.constant 0 : i32
    %c0_i32_1 = arith.constant 0 : i32
    return %c0_i32, %c0_i32_0 : i32, i32
  }
  func.func @transform_4(%arg0: i32) -> (i32, i32) {
    %c0_i32 = arith.constant 0 : i32
    %c0_i32_0 = arith.constant 0 : i32
    %c0_i32_1 = arith.constant 0 : i32
    return %c0_i32, %c0_i32_0 : i32, i32
  }
  func.func @transform_5(%arg0: i32) -> (i32, i32) {
    %c0_i32 = arith.constant 0 : i32
    %c0_i32_0 = arith.constant 0 : i32
    %c0_i32_1 = arith.constant 0 : i32
    return %c0_i32, %c0_i32_0 : i32, i32
  }
  func.func @transform_6(%arg0: i32) -> (i32, i32) {
    %c0_i32 = arith.constant 0 : i32
    %c0_i32_0 = arith.constant 0 : i32
    %c0_i32_1 = arith.constant 0 : i32
    return %c0_i32, %c0_i32_0 : i32, i32
  }
  func.func @transform_7(%arg0: i32) -> (i32, i32) {
    %c0_i32 = arith.constant 0 : i32
    %c0_i32_0 = arith.constant 0 : i32
    %c0_i32_1 = arith.constant 0 : i32
    return %c0_i32, %c0_i32_0 : i32, i32
  }
  func.func @transform_8(%arg0: i32) -> (i32, i32) {
    %c0_i32 = arith.constant 0 : i32
    %c0_i32_0 = arith.constant 0 : i32
    %c0_i32_1 = arith.constant 0 : i32
    return %c0_i32, %c0_i32_0 : i32, i32
  }
  func.func @transform_9(%arg0: i32) -> (i32, i32) {
    %c0_i32 = arith.constant 0 : i32
    %c0_i32_0 = arith.constant 0 : i32
    return %c0_i32, %arg0 : i32, i32
  }
}

</mosaic_0001>

<bundles_post_ra>
// kernel: tpu_custom_call.1
= control target key start
LH: loop header
LB: loop body
LE: loop exit
PB: predicated region body
PF: predicated region fallthrough
CT: control target
= control target key end

     0   :  { %v3579_v2 = vmov 0   ;;  %v3576_v4 = vmov 1   ;;  %s3562_s0 = inlined_call_operand.vmem [shape: f32[8,16], index: 0, kind: input, shape index: {}]   ;;  %s3563_s1 = inlined_call_operand.vmem [shape: f32[128,8], index: 1, kind: input, shape index: {}]   ;;  %s3564_s2 = inlined_call_operand.vmem [shape: f32[128,1], index: 2, kind: input, shape index: {}]   ;;  %s3565_s3 = inlined_call_operand.vmem [shape: f32[256,128], index: 3, kind: input, shape index: {}]   ;;  %s3566_s4 = inlined_call_operand.vmem [shape: f32[256,1], index: 4, kind: input, shape index: {}]   ;;  %s3567_s5 = inlined_call_operand.vmem [shape: f32[128,256], index: 5, kind: input, shape index: {}]   ;;  %s3568_s6 = inlined_call_operand.vmem [shape: f32[128,1], index: 6, kind: input, shape index: {}]   ;;  %s3569_s7 = inlined_call_operand.vmem [shape: f32[8,128], index: 7, kind: input, shape index: {}]   ;;  %s3570_s8 = inlined_call_operand.vmem [shape: f32[8,1], index: 8, kind: input, shape index: {}]   ;;  %s3571_s9 = inlined_call_operand.hbm [shape: f32[8,16], index: 9, kind: output, shape index: {}]  }
   0x1   :  { %v65_v0 = vld [vmem:[%s3564_s2 + $0x78] sm:$0xff]  ;;  %2113 = vset.pattern.permute.xlu1 %v3579_v2  ;;  %2112 = vset.pattern.permute.xlu0 %v3579_v2  ;;  %v2302_v3 = vld [vmem:[%s3563_s1 + $0x70] sm:$0xff]  ;;  %v2310_v5 = vld [vmem:[%s3563_s1 + $0x68] sm:$0xff] }
   0x2   :  { %v2294_v1 = vld [vmem:[%s3563_s1 + $0x78] sm:$0xff]  ;;  %243 = vperm.xlu1 %2113, %v65_v0  }
   0x3   :  { %143 = vperm.xlu0 %2112, %v2294_v1  }
   0x6   :  { %2114 = vset.pattern.permute.xlu1 %v3576_v4 }
   0x7   :  { %138 = vperm.xlu0 %2112, %v2302_v3   ;;  %323 = vperm.xlu1 %2114, %v2294_v1  }
   0x8   :  { %14 = vsyncpa [#allocation3], 0  ;;  %v64_v6 = vld [vmem:[%s3564_s2 + $0x70] sm:$0xff]  ;;  %v63_v7 = vld [vmem:[%s3564_s2 + $0x68] sm:$0xff]  ;;  %v3583_v9 = vmov 2   ;;  %v3585_v18 = vmov 3  }
   0x9   :  { %v60_v8 = vld [vmem:[%s3564_s2 + $0x50] sm:$0xff]  ;;  %v2328_v10 = vld [vmem:[%s3563_s1 + $0x60] sm:$0xff]  ;;  %v2340_v11 = vld [vmem:[%s3563_s1 + $0x58] sm:$0xff]  ;;  %v3574_v25 = vmov 4   ;;  %v3581_v26 = vmov 5   ;;  %v3572_v28 = vmov 7  }
   0xa   :  { %v2348_v12 = vld [vmem:[%s3563_s1 + $0x48] sm:$0xff]  ;;  %v2355_v13 = vld [vmem:[%s3563_s1 + $0x40] sm:$0xff]  ;;  %v2365_v15 = vld [vmem:[%s3563_s1 + $0x38] sm:$0xff]  ;;  %v3577_v31 = vmov 6   ;;  %vm2236_vm0 = vmmov 0   ;;  %vm1825_vm1 = vcmask 130048  }
   0xb   :  { %133 = vperm.xlu0 %2112, %v2310_v5   ;;  %2115 = vset.pattern.permute.xlu1 %v3579_v2  ;;  %v62_v14 = vld [vmem:[%s3564_s2 + $0x60] sm:$0xff]  ;;  %v2371_v16 = vld [vmem:[%s3563_s1 + $0x30] sm:$0xff]  ;;  %v2379_v17 = vld [vmem:[%s3563_s1 + $0x28] sm:$0xff] }
   0xc   :  { %238 = vperm.xlu1 %2115, %v64_v6   ;;  %v2387_v19 = vld [vmem:[%s3563_s1 + $0x20] sm:$0xff]  ;;  %v2392_v20 = vld [vmem:[%s3563_s1 + $0x50] sm:$0xff]  ;;  %v2400_v21 = vld [vmem:[%s3563_s1 + $0x18] sm:$0xff] }
   0xd   :  { %v61_v22 = vld [vmem:[%s3564_s2 + $0x58] sm:$0xff]  ;;  %v2409_v23 = vld [vmem:[%s3563_s1 + $0x10] sm:$0xff]  ;;  %v2416_v24 = vld [vmem:[%s3563_s1 + $0x8] sm:$0xff] }
   0xe   :  { %3591 = vst [vmem:[#allocation5_spill] sm:$0xff] %v2409_v23  ;;  %v59_v27 = vld [vmem:[%s3564_s2 + $0x48] sm:$0xff]  ;;  %v58_v36 = vld [vmem:[%s3564_s2 + $0x40] sm:$0xff]  ;;  %v57_v51 = vld [vmem:[%s3564_s2 + $0x38] sm:$0xff] }
   0xf   :  { %233 = vperm.xlu0 %2112, %v63_v7   ;;  %v2515_v46 = vld [vmem:[%s3563_s1] sm:$0xff] }
  0x10   :  { %2116 = vset.pattern.permute.xlu1 %v3583_v9  ;;  %3593 = vst [vmem:[#allocation7_spill] sm:$0xff] %v2515_v46 }
  0x11   :  { %423 = vperm.xlu1 %2116, %v2294_v1  }
  0x13   :  { %218 = vperm.xlu0 %2112, %v60_v8  }
  0x15   :  { %2117 = vset.pattern.permute.xlu1 %v3579_v2 }
  0x16   :  { %128 = vperm.xlu1 %2117, %v2328_v10  }
  0x17   :  { %2128 = vset.pattern.permute.xlu0 %v3576_v4 }
  0x18   :  { %319 = vperm.xlu0 %2128, %v2302_v3  }
  0x1a   :  { %2118 = vset.pattern.permute.xlu1 %v3576_v4 }
  0x1b   :  { %315 = vperm.xlu1 %2118, %v2310_v5  }
  0x1c   :  { %311 = vperm.xlu0 %2128, %v2328_v10  }
  0x1f   :  { %2119 = vset.pattern.permute.xlu1 %v3583_v9 }
  0x20   :  { %307 = vperm.xlu0 %2128, %v2340_v11   ;;  %419 = vperm.xlu1 %2119, %v2302_v3  }
  0x24   :  { %299 = vperm.xlu0 %2128, %v2348_v12   ;;  %2120 = vset.pattern.permute.xlu1 %v3579_v2 }
  0x25   :  { %123 = vperm.xlu1 %2120, %v2340_v11  }
  0x28   :  { %295 = vperm.xlu0 %2128, %v2355_v13  }
  0x29   :  { %228 = vperm.xlu1 %2120, %v62_v14  }
  0x2c   :  { %291 = vperm.xlu0 %2128, %v2365_v15  }
  0x2d   :  { %2121 = vset.pattern.permute.xlu1 %v3583_v9 }
  0x2e   :  { %415 = vperm.xlu1 %2121, %v2310_v5  }
  0x30   :  { %287 = vperm.xlu0 %2128, %v2371_v16  }
  0x32   :  { %2122 = vset.pattern.permute.xlu1 %v3585_v18 }
  0x33   :  { %519 = vperm.xlu1 %2122, %v2302_v3  }
  0x34   :  { %283 = vperm.xlu0 %2128, %v2379_v17  }
  0x37   :  { %2123 = vset.pattern.permute.xlu1 %v3579_v2 }
  0x38   :  { %279 = vperm.xlu0 %2128, %v2387_v19   ;;  %118 = vperm.xlu1 %2123, %v2392_v20  }
  0x3c   :  { %275 = vperm.xlu0 %2128, %v2400_v21   ;;  %223 = vperm.xlu1 %2123, %v61_v22  }
  0x40   :  { %271 = vperm.xlu0 %2128, %v2409_v23   ;;  %2124 = vset.pattern.permute.xlu1 %v3583_v9 }
  0x41   :  { %411 = vperm.xlu1 %2124, %v2328_v10  }
  0x44   :  { %267 = vperm.xlu0 %2128, %v2416_v24  }
  0x45   :  { %2125 = vset.pattern.permute.xlu1 %v3585_v18 }
  0x46   :  { %515 = vperm.xlu1 %2125, %v2310_v5  }
  0x48   :  { %2174 = vset.pattern.permute.xlu0 %v3574_v25 }
  0x49   :  { %623 = vperm.xlu0 %2174, %v2294_v1  }
  0x4a   :  { %2126 = vset.pattern.permute.xlu1 %v3581_v26 }
  0x4b   :  { %723 = vperm.xlu1 %2126, %v2294_v1  }
  0x4d   :  { %619 = vperm.xlu0 %2174, %v2302_v3  }
  0x4f   :  { %2127 = vset.pattern.permute.xlu1 %v3579_v2 }
  0x50   :  { %113 = vperm.xlu1 %2127, %v2348_v12  }
  0x51   :  { %611 = vperm.xlu0 %2174, %v2328_v10  }
  0x54   :  { %2129 = vset.pattern.permute.xlu1 %v3576_v4 }
  0x55   :  { %607 = vperm.xlu0 %2174, %v2340_v11   ;;  %303 = vperm.xlu1 %2129, %v2392_v20  }
  0x59   :  { %603 = vperm.xlu0 %2174, %v2392_v20   ;;  %2130 = vset.pattern.permute.xlu1 %v3583_v9 }
  0x5a   :  { %407 = vperm.xlu1 %2130, %v2340_v11  }
  0x5d   :  { %599 = vperm.xlu0 %2174, %v2348_v12  }
  0x5e   :  { %2131 = vset.pattern.permute.xlu1 %v3574_v25 }
  0x5f   :  { %615 = vperm.xlu1 %2131, %v2310_v5  }
  0x61   :  { %595 = vperm.xlu0 %2174, %v2355_v13  }
  0x63   :  { %2132 = vset.pattern.permute.xlu1 %v3581_v26 }
  0x64   :  { %719 = vperm.xlu1 %2132, %v2302_v3  }
  0x65   :  { %591 = vperm.xlu0 %2174, %v2365_v15  }
  0x68   :  { %2133 = vset.pattern.permute.xlu1 %v3579_v2 }
  0x69   :  { %587 = vperm.xlu0 %2174, %v2371_v16   ;;  %108 = vperm.xlu1 %2133, %v2355_v13  }
  0x6d   :  { %583 = vperm.xlu0 %2174, %v2379_v17   ;;  %213 = vperm.xlu1 %2133, %v59_v27  }
  0x71   :  { %579 = vperm.xlu0 %2174, %v2387_v19   ;;  %2134 = vset.pattern.permute.xlu1 %v3583_v9 }
  0x72   :  { %403 = vperm.xlu1 %2134, %v2392_v20  }
  0x75   :  { %2177 = vset.pattern.permute.xlu0 %v3572_v28 }
  0x76   :  { %923 = vperm.xlu0 %2177, %v2294_v1   ;;  %2135 = vset.pattern.permute.xlu1 %v3585_v18 }
  0x77   :  { %507 = vperm.xlu1 %2135, %v2340_v11  }
  0x7a   :  { %919 = vperm.xlu0 %2177, %v2302_v3  }
  0x7b   :  { %2136 = vset.pattern.permute.xlu1 %v3581_v26 }
  0x7c   :  { %715 = vperm.xlu1 %2136, %v2310_v5  }
  0x7d   :  { %v2460_v29 = vpop.permute.xlu1 %243 }
  0x7e   :  { %v2462_v30 = vpop.permute.xlu0 %143  ;;  %915 = vperm.xlu0 %2177, %v2310_v5  }
  0x80   :  { %2137 = vset.pattern.permute.xlu1 %v3577_v31 }
  0x81   :  { %819 = vperm.xlu1 %2137, %v2302_v3  }
  0x82   :  { %911 = vperm.xlu0 %2177, %v2328_v10   ;;  %v2468_v32 = vpop.permute.xlu0 %138  ;;  %v2470_v33 = vpop.permute.xlu1 %323 }
  0x85   :  { %2138 = vset.pattern.permute.xlu1 %v3579_v2 }
  0x86   :  { %907 = vperm.xlu0 %2177, %v2340_v11   ;;  %v2474_v34 = vpop.permute.xlu0 %133  ;;  %103 = vperm.xlu1 %2138, %v2365_v15  }
  0x87   :  { %v2477_v35 = vpop.permute.xlu1 %238 }
  0x8a   :  { %903 = vperm.xlu0 %2177, %v2392_v20   ;;  %v2483_v37 = vpop.permute.xlu0 %233  ;;  %208 = vperm.xlu1 %2138, %v58_v36  }
  0x8c   :  { %v2485_v38 = vpop.permute.xlu1 %423 }
  0x8e   :  { %899 = vperm.xlu0 %2177, %v2348_v12   ;;  %v2488_v39 = vpop.permute.xlu0 %218  ;;  %2139 = vset.pattern.permute.xlu1 %v3583_v9 }
  0x8f   :  { %3592 = vst [vmem:[#allocation6_spill] sm:$0xff] %v2488_v39  ;;  %399 = vperm.xlu1 %2139, %v2348_v12  }
  0x91   :  { %v2492_v40 = vpop.permute.xlu1 %128 }
  0x92   :  { %895 = vperm.xlu0 %2177, %v2355_v13  }
  0x93   :  { %v2495_v41 = vpop.permute.xlu0 %319  ;;  %2140 = vset.pattern.permute.xlu1 %v3585_v18 }
  0x94   :  { %503 = vperm.xlu1 %2140, %v2392_v20  }
  0x96   :  { %891 = vperm.xlu0 %2177, %v2365_v15   ;;  %v2500_v42 = vpop.permute.xlu1 %315 }
  0x97   :  { %v2502_v43 = vpop.permute.xlu0 %311 }
  0x98   :  { %2141 = vset.pattern.permute.xlu1 %v3581_v26 }
  0x99   :  { %711 = vperm.xlu1 %2141, %v2328_v10  }
  0x9a   :  { %2182 = vset.pattern.permute.xlu0 %v3583_v9 }
  0x9b   :  { %367 = vperm.xlu0 %2182, %v2416_v24   ;;  %v2508_v44 = vpop.permute.xlu0 %307  ;;  %v2510_v45 = vpop.permute.xlu1 %419 }
  0x9d   :  { %2142 = vset.pattern.permute.xlu1 %v3577_v31 }
  0x9e   :  { %815 = vperm.xlu1 %2142, %v2310_v5  }
  0x9f   :  { %363 = vperm.xlu0 %2182, %v2515_v46   ;;  %v2520_v47 = vpop.permute.xlu0 %299 }
  0xa0   :  { %3594 = vst [vmem:[#allocation8_spill] sm:$0xff] %v2520_v47  ;;  %v2522_v48 = vpop.permute.xlu1 %123  ;;  %v146_v47 = vlaneseq }
  0xa2   :  { %2143 = vset.pattern.permute.xlu1 %v3579_v2 }
  0xa3   :  { %2187 = vset.pattern.permute.xlu0 %v3585_v18  ;;  %v2526_v49 = vpop.permute.xlu0 %295  ;;  %98 = vperm.xlu1 %2143, %v2371_v16  }
  0xa4   :  { %3595 = vst [vmem:[#allocation9_spill] sm:$0xff] %v2526_v49  ;;  %523 = vperm.xlu0 %2187, %v2294_v1   ;;  %v2530_v50 = vpop.permute.xlu1 %228 }
  0xa7   :  { %v2535_v52 = vpop.permute.xlu0 %291  ;;  %203 = vperm.xlu1 %2143, %v57_v51  }
  0xa8   :  { %3596 = vst [vmem:[#allocation10_spill] sm:$0xff] %v2535_v52  ;;  %511 = vperm.xlu0 %2187, %v2328_v10  }
  0xa9   :  { %v2538_v53 = vpop.permute.xlu1 %415 }
  0xab   :  { %v2540_v54 = vpop.permute.xlu0 %287  ;;  %2144 = vset.pattern.permute.xlu1 %v3583_v9 }
  0xac   :  { %3597 = vst [vmem:[#allocation11_spill] sm:$0xff] %v2540_v54  ;;  %463 = vperm.xlu0 %2187, %v2515_v46   ;;  %395 = vperm.xlu1 %2144, %v2355_v13   ;;  %v54_v54 = vld [vmem:[%s3564_s2 + $0x20] sm:$0xff] }
  0xae   :  { %v2545_v55 = vpop.permute.xlu1 %519 }
  0xaf   :  { %v2547_v56 = vpop.permute.xlu0 %283 }
  0xb0   :  { %3598 = vst [vmem:[#allocation12_spill] sm:$0xff] %v2547_v56  ;;  %2192 = vset.pattern.permute.xlu0 %v3577_v31  ;;  %2145 = vset.pattern.permute.xlu1 %v3585_v18  ;;  %v3620_v56 = vmov 6  }
  0xb1   :  { %823 = vperm.xlu0 %2192, %v2294_v1   ;;  %499 = vperm.xlu1 %2145, %v2348_v12   ;;  %v56_v1 = vld [vmem:[%s3564_s2 + $0x30] sm:$0xff] }
  0xb3   :  { %v2553_v57 = vpop.permute.xlu0 %279  ;;  %v2555_v58 = vpop.permute.xlu1 %118 }
  0xb4   :  { %3599 = vst [vmem:[#allocation13_spill] sm:$0xff] %v2553_v57  ;;  %3600 = vst [vmem:[#allocation14_spill] sm:$0xff] %v2555_v58 }
  0xb5   :  { %775 = vperm.xlu0 %2192, %v2400_v21   ;;  %2146 = vset.pattern.permute.xlu1 %v3581_v26 }
  0xb6   :  { %707 = vperm.xlu1 %2146, %v2340_v11  }
  0xb7   :  { %v2560_v59 = vpop.permute.xlu0 %275  ;;  %v2562_v60 = vpop.permute.xlu1 %223 }
  0xb8   :  { %3601 = vst [vmem:[#allocation15_spill] sm:$0xff] %v2560_v59 }
  0xb9   :  { %2195 = vset.pattern.permute.xlu0 %v3581_v26 }
  0xba   :  { %679 = vperm.xlu0 %2195, %v2387_v19   ;;  %2147 = vset.pattern.permute.xlu1 %v3577_v31 }
  0xbb   :  { %v2567_v61 = vpop.permute.xlu0 %271  ;;  %811 = vperm.xlu1 %2147, %v2328_v10  }
  0xbc   :  { %3602 = vst [vmem:[#allocation16_spill] sm:$0xff] %v2567_v61  ;;  %v2570_v62 = vpop.permute.xlu1 %411 }
  0xbe   :  { %675 = vperm.xlu0 %2195, %v2400_v21  }
  0xbf   :  { %v2573_v63 = vpop.permute.xlu0 %267  ;;  %2148 = vset.pattern.permute.xlu1 %v3579_v2 }
  0xc0   :  { %3603 = vst [vmem:[#allocation17_spill] sm:$0xff] %v2573_v63  ;;  %93 = vperm.xlu1 %2148, %v2379_v17  }
  0xc1   :  { %v2577_v0 = vpop.permute.xlu1 %515 }
  0xc2   :  { %667 = vperm.xlu0 %2195, %v2416_v24  }
  0xc4   :  { %v2583_v3 = vpop.permute.xlu0 %623  ;;  %198 = vperm.xlu1 %2148, %v56_v1  }
  0xc6   :  { %663 = vperm.xlu0 %2195, %v2515_v46   ;;  %v2586_v5 = vpop.permute.xlu1 %723 }
  0xc8   :  { %v2588_v6 = vpop.permute.xlu0 %619  ;;  %2149 = vset.pattern.permute.xlu1 %v3583_v9 }
  0xc9   :  { %391 = vperm.xlu1 %2149, %v2365_v15  }
  0xca   :  { %2201 = vset.pattern.permute.xlu0 %v3572_v28  ;;  %v55_v28 = vld [vmem:[%s3564_s2 + $0x28] sm:$0xff] }
  0xcb   :  { %871 = vperm.xlu0 %2201, %v2409_v23   ;;  %v2594_v7 = vpop.permute.xlu1 %113 }
  0xcc   :  { %3604 = vst [vmem:[#allocation18_spill] sm:$0xff] %v2594_v7  ;;  %v2596_v8 = vpop.permute.xlu0 %611  ;;  %v2688_v7 = vshrl.u32 %v146_v47, 7 }
  0xcd   :  { %2150 = vset.pattern.permute.xlu1 %v3585_v18 }
  0xce   :  { %495 = vperm.xlu1 %2150, %v2355_v13   ;;  %v528_v39 = vsub.s32 3, %v2688_v7 }
  0xcf   :  { %863 = vperm.xlu0 %2201, %v2515_v46  }
  0xd0   :  { %v2601_v10 = vpop.permute.xlu0 %607  ;;  %v2603_v14 = vpop.permute.xlu1 %303 }
  0xd1   :  { %3605 = vst [vmem:[#allocation19_spill] sm:$0xff] %v2601_v10  ;;  %3606 = vst [vmem:[#allocation20_spill] sm:$0xff] %v2603_v14  ;;  %v728_v10 = vsub.s32 5, %v2688_v7 }
  0xd2   :  { %2151 = vset.pattern.permute.xlu1 %v3581_v26 }
  0xd3   :  { %2204 = vset.pattern.permute.xlu0 %v3579_v2  ;;  %703 = vperm.xlu1 %2151, %v2392_v20  }
  0xd4   :  { %v2608_v22 = vpop.permute.xlu0 %603 }
  0xd5   :  { %3607 = vst [vmem:[#allocation21_spill] sm:$0xff] %v2608_v22  ;;  %v2610_v27 = vpop.permute.xlu1 %407  ;;  %v148_v22 = vsub.s32 0, %v2688_v7 }
  0xd6   :  { %3608 = vst [vmem:[#allocation22_spill] sm:$0xff] %v2610_v27 }
  0xd7   :  { %2152 = vset.pattern.permute.xlu1 %v3577_v31 }
  0xd8   :  { %v2613_v36 = vpop.permute.xlu0 %599  ;;  %807 = vperm.xlu1 %2152, %v2340_v11  }
  0xd9   :  { %3609 = vst [vmem:[#allocation23_spill] sm:$0xff] %v2613_v36  ;;  %v3627_v36 = vmov 3  }
  0xda   :  { %v2616_v51 = vpop.permute.xlu1 %615 }
  0xdc   :  { %v2618_v1 = vpop.permute.xlu0 %595  ;;  %2153 = vset.pattern.permute.xlu1 %v3579_v2 }
  0xdd   :  { %3610 = vst [vmem:[#allocation24_spill] sm:$0xff] %v2618_v1  ;;  %88 = vperm.xlu1 %2153, %v2387_v19   ;;  %v3624_v1 = vmov 2  }
  0xdf   :  { %v2625_v25 = vpop.permute.xlu1 %719 }
  0xe0   :  { %v2627_v4 = vpop.permute.xlu0 %591 }
  0xe1   :  { %3611 = vst [vmem:[#allocation25_spill] sm:$0xff] %v2627_v4  ;;  %193 = vperm.xlu1 %2153, %v55_v28   ;;  %v3618_v28 = vmov 5  }
  0xe4   :  { %v2629_v31 = vpop.permute.xlu0 %587  ;;  %v2631_v11 = vpop.permute.xlu1 %108 }
  0xe5   :  { %3612 = vst [vmem:[#allocation26_spill] sm:$0xff] %v2629_v31  ;;  %3613 = vst [vmem:[#allocation27_spill] sm:$0xff] %v2631_v11  ;;  %2154 = vset.pattern.permute.xlu1 %v3583_v9 }
  0xe6   :  { %387 = vperm.xlu1 %2154, %v2371_v16  }
  0xe8   :  { %v2635_v2 = vpop.permute.xlu0 %583  ;;  %v2637_v26 = vpop.permute.xlu1 %213 }
  0xe9   :  { %3614 = vst [vmem:[#allocation28_spill] sm:$0xff] %v2635_v2  ;;  %3615 = vst [vmem:[#allocation29_spill] sm:$0xff] %v2637_v26 }
  0xea   :  { %2155 = vset.pattern.permute.xlu1 %v3585_v18 }
  0xeb   :  { %491 = vperm.xlu1 %2155, %v2365_v15  }
  0xec   :  { %v2641_v61 = vpop.permute.xlu0 %579 }
  0xed   :  { %3616 = vst [vmem:[#allocation30_spill] sm:$0xff] %v2641_v61  ;;  %v2643_v59 = vpop.permute.xlu1 %403  ;;  %v3621_v61 = vmov 0  }
  0xee   :  { %3617 = vst [vmem:[#allocation31_spill] sm:$0xff] %v2643_v59  ;;  %v53_v59 = vld [vmem:[%s3564_s2 + $0x18] sm:$0xff] }
  0xef   :  { %2156 = vset.pattern.permute.xlu1 %v3618_v28 }
  0xf0   :  { %699 = vperm.xlu1 %2156, %v2348_v12  }
  0xf1   :  { %v2647_v57 = vpop.permute.xlu0 %923 }
  0xf2   :  { %v2649_v9 = vpop.permute.xlu1 %507 }
  0xf3   :  { %3619 = vst [vmem:[#allocation32_spill] sm:$0xff] %v2649_v9 }
  0xf4   :  { %2157 = vset.pattern.permute.xlu1 %v3620_v56 }
  0xf5   :  { %v2652_v2 = vpop.permute.xlu0 %919  ;;  %803 = vperm.xlu1 %2157, %v2392_v20  }
  0xf7   :  { %v2655_v18 = vpop.permute.xlu1 %715 }
  0xf9   :  { %v2657_v31 = vpop.permute.xlu0 %915  ;;  %2158 = vset.pattern.permute.xlu1 %v3621_v61 }
  0xfa   :  { %83 = vperm.xlu1 %2158, %v2400_v21  }
  0xfc   :  { %v2664_v63 = vpop.permute.xlu1 %819 }
  0xfd   :  { %v2666_v4 = vpop.permute.xlu0 %911 }
  0xfe   :  { %188 = vperm.xlu1 %2158, %v54_v54  }
 0x101   :  { %v2668_v52 = vpop.permute.xlu0 %907  ;;  %v2670_v20 = vpop.permute.xlu1 %103 }
 0x102   :  { %3622 = vst [vmem:[#allocation33_spill] sm:$0xff] %v2668_v52  ;;  %3623 = vst [vmem:[#allocation34_spill] sm:$0xff] %v2670_v20  ;;  %2159 = vset.pattern.permute.xlu1 %v3624_v1 }
 0x103   :  { %383 = vperm.xlu1 %2159, %v2379_v17  }
 0x105   :  { %v2674_v49 = vpop.permute.xlu0 %903  ;;  %v2676_v11 = vpop.permute.xlu1 %208 }
 0x106   :  { %3625 = vst [vmem:[#allocation35_spill] sm:$0xff] %v2674_v49  ;;  %3626 = vst [vmem:[#allocation36_spill] sm:$0xff] %v2676_v11 }
 0x107   :  { %2160 = vset.pattern.permute.xlu1 %v3627_v36 }
 0x108   :  { %487 = vperm.xlu1 %2160, %v2371_v16  }
 0x109   :  { %v2680_v26 = vpop.permute.xlu0 %899 }
 0x10a   :  { %3628 = vst [vmem:[#allocation37_spill] sm:$0xff] %v2680_v26  ;;  %v2682_v54 = vpop.permute.xlu1 %399  ;;  %v2700_v26 = vld [vmem:[%s3562_s0] sm:$0xff]  ;;  %s2237_s0 = smov [#allocation2]  }
 0x10b   :  { %3629 = vst [vmem:[#allocation38_spill] sm:$0xff] %v2682_v54  ;;  %v2765_v27 = vrot.slane %v2700_v26, %v728_v10  ;;  %s1833_s24 = sshll.u32 %s2237_s0, 4  ;;  %s1834_s24 = int_to_ptr.vmem [resolvable:$true] %s1833_s24 }
 0x10c   :  { %2161 = vset.pattern.permute.xlu1 %v3618_v28  ;;  %s2205_s25 = scalar_lea.vmem %s1834_s24, 128  ;;  %p2210_p1 = scmp.lt.s32.totalorder %s1834_s24, %s1834_s24 }
 0x10d   :  { %v2685_v20 = vpop.permute.xlu0 %895  ;;  %695 = vperm.xlu1 %2161, %v2355_v13   ;;  %p2206_p0 = scmp.ne.s32.totalorder %s1834_s24, %s2205_s25  ;;  %p2211_p2 = scmp.lt.s32.totalorder %s2205_s25, %s2205_s25 }
 0x10e   :  { %3630 = vst [vmem:[#allocation39_spill] sm:$0xff] %v2685_v20  ;;  %v328_v20 = vsub.s32 1, %v2688_v7 }
 0x10f   :  { %v2690_v49 = vpop.permute.xlu1 %503  ;;  %p2212_p3 = por %p2211_p2, %p2210_p1 }
 0x110   :  { %3631 = vst [vmem:[#allocation40_spill] sm:$0xff] %v2690_v49  ;;  %v2708_v49 = vrot.slane %v2700_v26, %v148_v22 }
 0x111   :  { %v2692_v11 = vpop.permute.xlu0 %891  ;;  %2162 = vset.pattern.permute.xlu1 %v3620_v56  ;;  %p2213_p4 = pnand %p2212_p3, %p2206_p0 }
 0x112   :  { %3632 = vst [vmem:[#allocation41_spill] sm:$0xff] %v2692_v11  ;;  %799 = vperm.xlu1 %2162, %v2348_v12   ;;  %v428_v11 = vsub.s32 2, %v2688_v7  ;;  %v2714_v12 = vrot.slane %v2700_v26, %v328_v20  ;;  %v165_v22 = vmul.f32 %v2708_v49, %v2462_v30  ;;  %v163_v20 = vmul.f32 %v2708_v49, %v2474_v34 }
 0x113   :  { %v164_v46 = vmul.f32 %v2708_v49, %v2468_v32 }
 0x114   :  { %v2703_v54 = vpop.permute.xlu1 %711  ;;  %v2727_v58 = vrot.slane %v2700_v26, %v428_v11  ;;  %v345_v52 = vmul.f32 %v2714_v12, %v2470_v33  ;;  %v261_v30 = vadd.f32 %v2460_v29, %v165_v22  ;;  %v344_v34 = vmul.f32 %v2714_v12, %v2495_v41 }
 0x115   :  { %v259_v33 = vadd.f32 %v2483_v37, %v163_v20  ;;  %v343_v32 = vmul.f32 %v2714_v12, %v2500_v42  ;;  %v828_v29 = vsub.s32 6, %v2688_v7  ;;  %v260_v41 = vadd.f32 %v2477_v35, %v164_v46 }
 0x116   :  { %v2705_v47 = vpop.permute.xlu0 %367  ;;  %2163 = vset.pattern.permute.xlu1 %v3621_v61  ;;  %v445_v11 = vmul.f32 %v2727_v58, %v2485_v38  ;;  %v361_v38 = vadd.f32 %v345_v52, %v261_v30  ;;  %v444_v22 = vmul.f32 %v2727_v58, %v2510_v45  ;;  %v443_v37 = vmul.f32 %v2727_v58, %v2538_v53 }
 0x117   :  { %3633 = vst [vmem:[#allocation42_spill] sm:$0xff] %v2705_v47  ;;  %78 = vperm.xlu1 %2163, %v2409_v23   ;;  %v628_v23 = vsub.s32 4, %v2688_v7  ;;  %v359_v46 = vadd.f32 %v343_v32, %v259_v33  ;;  %v928_v45 = vsub.s32 7, %v2688_v7  ;;  %v2773_v30 = vrot.slane %v2700_v26, %v828_v29 }
 0x118   :  { %v461_v42 = vadd.f32 %v445_v11, %v361_v38  ;;  %v744_v32 = vmul.f32 %v2765_v27, %v2625_v25 }
 0x119   :  { %v2720_v14 = vpop.permute.xlu1 %815  ;;  %v459_v33 = vadd.f32 %v443_v37, %v359_v46  ;;  %v844_v25 = vmul.f32 %v2773_v30, %v2664_v63  ;;  %v442_v37 = vmul.f32 %v2727_v58, %v2570_v62 }
 0x11a   :  { %v2722_v47 = vpop.permute.xlu0 %363 }
 0x11b   :  { %3634 = vst [vmem:[#allocation43_spill] sm:$0xff] %v2722_v47  ;;  %183 = vperm.xlu1 %2163, %v53_v59   ;;  %v2737_v47 = vrot.slane %v2700_v26, %v528_v39  ;;  %v2751_v39 = vrot.slane %v2700_v26, %v628_v23  ;;  %v360_v23 = vadd.f32 %v344_v34, %v260_v41 }
 0x11c   :  { %v162_v34 = vmul.f32 %v2708_v49, %v2492_v40  ;;  %v2793_v40 = vrot.slane %v2700_v26, %v928_v45 }
 0x11d   :  { %v544_v20 = vmul.f32 %v2737_v47, %v2545_v55  ;;  %v460_v53 = vadd.f32 %v444_v22, %v360_v23  ;;  %v645_v11 = vmul.f32 %v2751_v39, %v2583_v3  ;;  %v644_v55 = vmul.f32 %v2751_v39, %v2588_v6 }
 0x11e   :  { %v2745_v59 = vpop.permute.xlu1 %98  ;;  %v643_v7 = vmul.f32 %v2751_v39, %v2616_v51  ;;  %v342_v6 = vmul.f32 %v2714_v12, %v2502_v43  ;;  %v743_v51 = vmul.f32 %v2765_v27, %v2655_v18  ;;  %v745_v43 = vmul.f32 %v2765_v27, %v2586_v5 }
 0x11f   :  { %3635 = vst [vmem:[#allocation44_spill] sm:$0xff] %v2745_v59  ;;  %v524_v9 = vpop.permute.xlu0 %523  ;;  %2164 = vset.pattern.permute.xlu1 %v3624_v1  ;;  %v945_v63 = vmul.f32 %v2793_v40, %v2647_v57  ;;  %v944_v23 = vmul.f32 %v2793_v40, %v2652_v2  ;;  %v642_v2 = vmul.f32 %v2751_v39, %v2596_v8 }
 0x120   :  { %v545_v59 = vmul.f32 %v2737_v47, %v524_v9  ;;  %379 = vperm.xlu1 %2164, %v2387_v19   ;;  %v543_v9 = vmul.f32 %v2737_v47, %v2577_v0  ;;  %v560_v0 = vadd.f32 %v544_v20, %v460_v53 }
 0x122   :  { %v2767_v52 = vpop.permute.xlu1 %203  ;;  %v561_v10 = vadd.f32 %v545_v59, %v461_v42  ;;  %v258_v59 = vadd.f32 %v2530_v50, %v162_v34  ;;  %v559_v29 = vadd.f32 %v543_v9, %v459_v33  ;;  %v660_v41 = vadd.f32 %v644_v55, %v560_v0 }
 0x123   :  { %v512_v35 = vpop.permute.xlu0 %511  ;;  %v843_v42 = vmul.f32 %v2773_v30, %v2720_v14 }
 0x124   :  { %2165 = vset.pattern.permute.xlu1 %v3627_v36  ;;  %v661_v22 = vadd.f32 %v645_v11, %v561_v10  ;;  %v659_v26 = vadd.f32 %v643_v7, %v559_v29  ;;  %v760_v50 = vadd.f32 %v744_v32, %v660_v41  ;;  %v358_v18 = vadd.f32 %v342_v6, %v258_v59 }
 0x125   :  { %483 = vperm.xlu1 %2165, %v2379_v17   ;;  %v542_v62 = vmul.f32 %v2737_v47, %v512_v35  ;;  %v943_v11 = vmul.f32 %v2793_v40, %v2657_v31  ;;  %v742_v6 = vmul.f32 %v2765_v27, %v2703_v54  ;;  %v942_v29 = vmul.f32 %v2793_v40, %v2666_v4 }
 0x126   :  { %v759_v46 = vadd.f32 %v743_v51, %v659_v26  ;;  %v860_v9 = vadd.f32 %v844_v25, %v760_v50  ;;  %v761_v5 = vadd.f32 %v745_v43, %v661_v22  ;;  %v458_v14 = vadd.f32 %v442_v37, %v358_v18  ;;  %v3636_v18 = vld [vmem:[#allocation22_spill] sm:$0xff] }
 0x127   :  { %v2787_v3 = vpop.permute.xlu0 %463  ;;  %v2795_v38 = vpop.permute.xlu1 %395  ;;  %v161_v4 = vmul.f32 %v2708_v49, %v2522_v48  ;;  %v341_v50 = vmul.f32 %v2714_v12, %v2508_v44  ;;  %v3638_v44 = vld [vmem:[#allocation19_spill] sm:$0xff] }
 0x128   :  { %v859_v55 = vadd.f32 %v843_v42, %v759_v46  ;;  %v558_v57 = vadd.f32 %v542_v62, %v458_v14  ;;  %v960_v34 = vadd.f32 %v944_v23, %v860_v9  ;;  %v3639_v14 = vld [vmem:[#allocation7_spill] sm:$0xff] }
 0x129   :  { %2166 = vset.pattern.permute.xlu1 %v3618_v28  ;;  %v257_v42 = vadd.f32 %v2562_v60, %v161_v4  ;;  %v641_v60 = vmul.f32 %v2751_v39, %v3638_v44  ;;  %v3646_v4 = vld [vmem:[#allocation40_spill] sm:$0xff] }
 0x12a   :  { %691 = vperm.xlu1 %2166, %v2365_v15   ;;  %v959_v7 = vadd.f32 %v943_v11, %v859_v55  ;;  %v658_v32 = vadd.f32 %v642_v2, %v558_v57  ;;  %v976_v31 = vmax.f32 %v960_v34, 0.0  ;;  %v51_v55 = vld [vmem:[%s3564_s2 + $0x8] sm:$0xff] }
 0x12b   :  { %v357_v62 = vadd.f32 %v341_v50, %v257_v42  ;;  %v3640_v2 = vld [vmem:[#allocation33_spill] sm:$0xff]  ;;  %v540_v50 = vmul.f32 %v2737_v47, %v3646_v4 }
 0x12c   :  { %v824_v20 = vpop.permute.xlu0 %823  ;;  %v2815_v53 = vpop.permute.xlu1 %499  ;;  %v975_v59 = vmax.f32 %v959_v7, 0.0  ;;  %v758_v41 = vadd.f32 %v742_v6, %v658_v32  ;;  %v3641_v7 = vld [vmem:[#allocation5_spill] sm:$0xff]  ;;  %v3642_v6 = vld [vmem:[#allocation14_spill] sm:$0xff] }
 0x12d   :  { %v845_v45 = vmul.f32 %v2773_v30, %v824_v20  ;;  %v3637_v20 = vld [vmem:[#allocation32_spill] sm:$0xff]  ;;  %v539_v4 = vmul.f32 %v2737_v47, %v2815_v53 }
 0x12e   :  { %2167 = vset.pattern.permute.xlu1 %v3620_v56  ;;  %v541_v48 = vmul.f32 %v2737_v47, %v3637_v20 }
 0x12f   :  { %v861_v10 = vadd.f32 %v845_v45, %v761_v5  ;;  %795 = vperm.xlu1 %2167, %v2355_v13   ;;  %v52_v13 = vld [vmem:[%s3564_s2 + $0x10] sm:$0xff] }
 0x131   :  { %v961_v35 = vadd.f32 %v945_v63, %v861_v10  ;;  %v708_v33 = vpop.permute.xlu1 %707  ;;  %v441_v63 = vmul.f32 %v2727_v58, %v3636_v18  ;;  %v3647_v18 = vld [vmem:[#allocation21_spill] sm:$0xff] }
 0x132   :  { %v741_v45 = vmul.f32 %v2765_v27, %v708_v33 }
 0x133   :  { %v977_v0 = vmax.f32 %v961_v35, 0.0  ;;  %2168 = vset.pattern.permute.xlu1 %v3621_v61  ;;  %v457_v46 = vadd.f32 %v441_v63, %v357_v62  ;;  %v640_v63 = vmul.f32 %v2751_v39, %v3647_v18  ;;  %v3656_v18 = vld [vmem:[#allocation23_spill] sm:$0xff] }
 0x134   :  { %73 = vperm.xlu1 %2168, %v2416_v24  }
 0x135   :  { %1986 = vmatprep.subr.mxu0 %v977_v0  ;;  %v557_v9 = vadd.f32 %v541_v48, %v457_v46  ;;  %v50_v48 = vld [vmem:[%s3564_s2] sm:$0xff] }
 0x136   :  { %1987 = vmatpush3.msra.mxu0 %v977_v0  ;;  %v812_v8 = vpop.permute.xlu1 %811 }
 0x137   :  { %1988 = vmatprep.subr.mxu0 %v976_v31  ;;  %v842_v51 = vmul.f32 %v2773_v30, %v812_v8  ;;  %v657_v11 = vadd.f32 %v641_v60, %v557_v9  ;;  %v3648_v9 = vld [vmem:[#allocation35_spill] sm:$0xff] }
 0x138   :  { %1989 = vmatpush3.msra.mxu0 %v976_v31  ;;  %178 = vperm.xlu1 %2168, %v52_v13   ;;  %v160_v13 = vmul.f32 %v2708_v49, %v3642_v6 }
 0x139   :  { %1990 = vmatprep.subr.mxu0 %v975_v59  ;;  %v858_v25 = vadd.f32 %v842_v51, %v758_v41  ;;  %v757_v57 = vadd.f32 %v741_v45, %v657_v11  ;;  %v3645_v51 = vld [vmem:[#allocation31_spill] sm:$0xff]  ;;  %v940_v45 = vmul.f32 %v2793_v40, %v3648_v9  ;;  %v3657_v9 = vld [vmem:[#allocation37_spill] sm:$0xff] }
 0x13a   :  { %1991 = vmatpush3.msra.mxu0 %v975_v59  ;;  %v3643_v59 = vld [vmem:[#allocation20_spill] sm:$0xff]  ;;  %v939_v53 = vmul.f32 %v2793_v40, %v3657_v9 }
 0x13b   :  { %v2833_v54 = vpop.permute.xlu1 %93  ;;  %v958_v22 = vadd.f32 %v942_v29, %v858_v25  ;;  %v340_v29 = vmul.f32 %v2714_v12, %v3643_v59  ;;  %v440_v25 = vmul.f32 %v2727_v58, %v3645_v51 }
 0x13c   :  { %2169 = vset.pattern.permute.xlu1 %v3624_v1 }
 0x13d   :  { %375 = vperm.xlu1 %2169, %v2400_v21   ;;  %v974_v37 = vmax.f32 %v958_v22, 0.0 }
 0x13f   :  { %v2837_v43 = vpop.permute.xlu1 %198  ;;  %1992 = vmatprep.subr.mxu0 %v974_v37 }
 0x140   :  { %1993 = vmatpush3.msra.mxu0 %v974_v37 }
 0x141   :  { %2170 = vset.pattern.permute.xlu1 %v3627_v36 }
 0x142   :  { %479 = vperm.xlu1 %2170, %v2387_v19  }
 0x144   :  { %v2843_v26 = vpop.permute.xlu1 %391 }
 0x146   :  { %2171 = vset.pattern.permute.xlu1 %v3618_v28 }
 0x147   :  { %687 = vperm.xlu1 %2171, %v2371_v16  }
 0x149   :  { %v2852_v23 = vpop.permute.xlu1 %495 }
 0x14b   :  { %2172 = vset.pattern.permute.xlu1 %v3620_v56 }
 0x14c   :  { %791 = vperm.xlu1 %2172, %v2365_v15   ;;  %v941_v15 = vmul.f32 %v2793_v40, %v3640_v2 }
 0x14e   :  { %v704_v5 = vpop.permute.xlu1 %703 }
 0x14f   :  { %v740_v46 = vmul.f32 %v2765_v27, %v704_v5 }
 0x150   :  { %2173 = vset.pattern.permute.xlu1 %v3621_v61 }
 0x151   :  { %68 = vperm.xlu1 %2173, %v3639_v14  }
 0x153   :  { %v808_v10 = vpop.permute.xlu1 %807 }
 0x154   :  { %v841_v35 = vmul.f32 %v2773_v30, %v808_v10  ;;  %v3649_v10 = vmov 1  }
 0x155   :  { %173 = vperm.xlu1 %2173, %v51_v55  }
 0x156   :  { %v857_v34 = vadd.f32 %v841_v35, %v757_v57 }
 0x158   :  { %v2869_v0 = vpop.permute.xlu1 %88  ;;  %v957_v33 = vadd.f32 %v941_v15, %v857_v34  ;;  %v3650_v34 = vmov 4  }
 0x159   :  { %2175 = vset.pattern.permute.xlu1 %v3624_v1  ;;  %v3644_v1 = vld [vmem:[#allocation6_spill] sm:$0xff] }
 0x15a   :  { %371 = vperm.xlu1 %2175, %v3641_v7   ;;  %v973_v32 = vmax.f32 %v957_v33, 0.0  ;;  %v256_v41 = vadd.f32 %v3644_v1, %v160_v13  ;;  %v3651_v33 = vld [vmem:[#allocation18_spill] sm:$0xff]  ;;  %v3652_v13 = vld [vmem:[#allocation8_spill] sm:$0xff] }
 0x15b   :  { %v339_v59 = vmul.f32 %v2714_v12, %v3652_v13  ;;  %v3660_v13 = vld [vmem:[#allocation36_spill] sm:$0xff] }
 0x15c   :  { %v2873_v31 = vpop.permute.xlu1 %193  ;;  %1994 = vmatprep.subr.mxu0 %v973_v32  ;;  %v356_v37 = vadd.f32 %v340_v29, %v256_v41  ;;  %v3653_v29 = vld [vmem:[#allocation29_spill] sm:$0xff]  ;;  %v3654_v41 = vld [vmem:[#allocation38_spill] sm:$0xff] }
 0x15d   :  { %1995 = vmatpush3.msra.mxu0 %v973_v32  ;;  %v159_v32 = vmul.f32 %v2708_v49, %v3651_v33  ;;  %v439_v51 = vmul.f32 %v2727_v58, %v3654_v41  ;;  %v3659_v33 = vld [vmem:[#allocation9_spill] sm:$0xff] }
 0x15e   :  { %2176 = vset.pattern.permute.xlu1 %v3627_v36  ;;  %v456_v42 = vadd.f32 %v440_v25, %v356_v37 }
 0x15f   :  { %475 = vperm.xlu1 %2176, %v2400_v21   ;;  %v255_v1 = vadd.f32 %v3653_v29, %v159_v32  ;;  %v338_v32 = vmul.f32 %v2714_v12, %v3659_v33  ;;  %v438_v29 = vmul.f32 %v2727_v58, %v2795_v38 }
 0x160   :  { %v556_v62 = vadd.f32 %v540_v50, %v456_v42  ;;  %v3655_v42 = vmov 7  }
 0x161   :  { %v2879_v8 = vpop.permute.xlu1 %387  ;;  %v355_v37 = vadd.f32 %v339_v59, %v255_v1 }
 0x162   :  { %v656_v44 = vadd.f32 %v640_v63, %v556_v62  ;;  %v639_v63 = vmul.f32 %v2751_v39, %v3656_v18 }
 0x163   :  { %2178 = vset.pattern.permute.xlu1 %v3618_v28  ;;  %v455_v50 = vadd.f32 %v439_v51, %v355_v37  ;;  %v538_v51 = vmul.f32 %v2737_v47, %v2852_v23 }
 0x164   :  { %683 = vperm.xlu1 %2178, %v2379_v17   ;;  %v756_v11 = vadd.f32 %v740_v46, %v656_v44 }
 0x165   :  { %v555_v62 = vadd.f32 %v539_v4, %v455_v50 }
 0x166   :  { %v2888_v22 = vpop.permute.xlu1 %491 }
 0x167   :  { %v655_v44 = vadd.f32 %v639_v63, %v555_v62  ;;  %v537_v33 = vmul.f32 %v2737_v47, %v2888_v22  ;;  %v3666_v22 = vld [vmem:[#allocation41_spill] sm:$0xff] }
 0x168   :  { %2179 = vset.pattern.permute.xlu1 %v3620_v56 }
 0x169   :  { %787 = vperm.xlu1 %2179, %v2371_v16  }
 0x16b   :  { %v700_v20 = vpop.permute.xlu1 %699 }
 0x16c   :  { %v739_v46 = vmul.f32 %v2765_v27, %v700_v20 }
 0x16d   :  { %2180 = vset.pattern.permute.xlu1 %v3621_v61 }
 0x16e   :  { %168 = vperm.xlu1 %2180, %v50_v48  }
 0x170   :  { %v804_v60 = vpop.permute.xlu1 %803 }
 0x171   :  { %v840_v55 = vmul.f32 %v2773_v30, %v804_v60 }
 0x172   :  { %2181 = vset.pattern.permute.xlu1 %v3649_v10 }
 0x173   :  { %v856_v2 = vadd.f32 %v840_v55, %v756_v11  ;;  %263 = vperm.xlu1 %2181, %v3639_v14  }
 0x175   :  { %v2906_v15 = vpop.permute.xlu1 %83  ;;  %v956_v57 = vadd.f32 %v940_v45, %v856_v2  ;;  %v755_v45 = vadd.f32 %v739_v46, %v655_v44  ;;  %v3658_v2 = vld [vmem:[#allocation27_spill] sm:$0xff] }
 0x176   :  { %v3662_v46 = vld [vmem:[#allocation39_spill] sm:$0xff] }
 0x177   :  { %2183 = vset.pattern.permute.xlu1 %v3627_v36  ;;  %v972_v5 = vmax.f32 %v956_v57, 0.0  ;;  %v158_v57 = vmul.f32 %v2708_v49, %v3658_v2  ;;  %v938_v23 = vmul.f32 %v2793_v40, %v3662_v46  ;;  %v437_v2 = vmul.f32 %v2727_v58, %v2843_v26  ;;  %v3668_v46 = vld [vmem:[#allocation42_spill] sm:$0xff] }
 0x178   :  { %471 = vperm.xlu1 %2183, %v3641_v7  }
 0x179   :  { %v2910_v35 = vpop.permute.xlu1 %188  ;;  %1996 = vmatprep.subr.mxu0 %v972_v5  ;;  %v254_v59 = vadd.f32 %v3660_v13, %v158_v57 }
 0x17a   :  { %1997 = vmatpush3.msra.mxu0 %v972_v5 }
 0x17b   :  { %v354_v41 = vadd.f32 %v338_v32, %v254_v59 }
 0x17c   :  { %2184 = vset.pattern.permute.xlu1 %v3650_v34 }
 0x17d   :  { %575 = vperm.xlu1 %2184, %v2400_v21   ;;  %v454_v37 = vadd.f32 %v438_v29, %v354_v41  ;;  %v937_v41 = vmul.f32 %v2793_v40, %v3666_v22 }
 0x17e   :  { %v2916_v6 = vpop.permute.xlu1 %383 }
 0x17f   :  { %v554_v50 = vadd.f32 %v538_v51, %v454_v37 }
 0x181   :  { %2185 = vset.pattern.permute.xlu1 %v3620_v56 }
 0x182   :  { %783 = vperm.xlu1 %2185, %v2379_v17  }
 0x183   :  { %v2925_v25 = vpop.permute.xlu1 %487 }
 0x186   :  { %2186 = vset.pattern.permute.xlu1 %v3655_v42 }
 0x187   :  { %887 = vperm.xlu1 %2186, %v2371_v16  }
 0x188   :  { %v696_v48 = vpop.permute.xlu1 %695 }
 0x189   :  { %v738_v38 = vmul.f32 %v2765_v27, %v696_v48 }
 0x18b   :  { %2188 = vset.pattern.permute.xlu1 %v3627_v36 }
 0x18c   :  { %467 = vperm.xlu1 %2188, %v2416_v24  }
 0x18d   :  { %v800_v60 = vpop.permute.xlu1 %799 }
 0x18e   :  { %v839_v11 = vmul.f32 %v2773_v30, %v800_v60 }
 0x190   :  { %v855_v16 = vadd.f32 %v839_v11, %v755_v45  ;;  %2189 = vset.pattern.permute.xlu1 %v3650_v34 }
 0x191   :  { %571 = vperm.xlu1 %2189, %v3641_v7  }
 0x192   :  { %v2941_v55 = vpop.permute.xlu1 %78  ;;  %v955_v20 = vadd.f32 %v939_v53, %v855_v16 }
 0x194   :  { %v971_v10 = vmax.f32 %v955_v20, 0.0 }
 0x195   :  { %2190 = vset.pattern.permute.xlu1 %v3620_v56 }
 0x196   :  { %v2944_v36 = vpop.permute.xlu1 %183  ;;  %779 = vperm.xlu1 %2190, %v2387_v19   ;;  %1998 = vmatprep.subr.mxu0 %v971_v10 }
 0x197   :  { %1999 = vmatpush3.msra.mxu0 %v971_v10 }
 0x19a   :  { %2191 = vset.pattern.permute.xlu1 %v3655_v42 }
 0x19b   :  { %v2950_v5 = vpop.permute.xlu1 %379  ;;  %883 = vperm.xlu1 %2191, %v2379_v17   ;;  %v3661_v17 = vld [vmem:[#allocation24_spill] sm:$0xff] }
 0x19c   :  { %v638_v4 = vmul.f32 %v2751_v39, %v3661_v17 }
 0x19e   :  { %v654_v63 = vadd.f32 %v638_v4, %v554_v50  ;;  %v978_v4 = vld [vmem:[%s3565_s3] sm:$0xff] }
 0x19f   :  { %2193 = vset.pattern.permute.xlu1 %v3650_v34  ;;  %2018 = vmatprep.mubr.f32.mxu0 %v978_v4 }
 0x1a0   :  { %v2959_v1 = vpop.permute.xlu1 %483  ;;  %567 = vperm.xlu1 %2193, %v2416_v24   ;;  %v754_v44 = vadd.f32 %v738_v38, %v654_v63 }
 0x1a4   :  { %2194 = vset.pattern.permute.xlu1 %v3618_v28 }
 0x1a5   :  { %v692_v18 = vpop.permute.xlu1 %691  ;;  %671 = vperm.xlu1 %2194, %v3641_v7  }
 0x1a9   :  { %2196 = vset.pattern.permute.xlu1 %v3655_v42 }
 0x1aa   :  { %v796_v62 = vpop.permute.xlu1 %795  ;;  %879 = vperm.xlu1 %2196, %v2387_v19   ;;  %v3663_v19 = vld [vmem:[#allocation34_spill] sm:$0xff] }
 0x1ab   :  { %v838_v28 = vmul.f32 %v2773_v30, %v796_v62  ;;  %v157_v11 = vmul.f32 %v2708_v49, %v3663_v19  ;;  %v3667_v62 = vld [vmem:[#allocation17_spill] sm:$0xff] }
 0x1ac   :  { %v1023_v19 = vld [vmem:[%s3566_s4 + $0x68] sm:$0xff] }
 0x1ad   :  { %v854_v60 = vadd.f32 %v838_v28, %v754_v44  ;;  %v253_v10 = vadd.f32 %v2767_v52, %v157_v11  ;;  %v737_v52 = vmul.f32 %v2765_v27, %v692_v18  ;;  %v1040_v18 = vld [vmem:[%s3566_s4 + $0xf0] sm:$0xff]  ;;  %v1039_v11 = vld [vmem:[%s3566_s4 + $0xe8] sm:$0xff] }
 0x1ae   :  { %2197 = vset.pattern.permute.xlu1 %v3650_v34  ;;  %v3664_v34 = vld [vmem:[#allocation10_spill] sm:$0xff] }
 0x1af   :  { %v74_v9 = vpop.permute.xlu1 %73  ;;  %563 = vperm.xlu1 %2197, %v3639_v14   ;;  %v954_v53 = vadd.f32 %v938_v23, %v854_v60  ;;  %v337_v20 = vmul.f32 %v2714_v12, %v3664_v34  ;;  %v431_v23 = vmul.f32 %v2727_v58, %v3668_v46  ;;  %v1024_v28 = vld [vmem:[%s3566_s4 + $0x70] sm:$0xff] }
 0x1b0   :  { %v151_v38 = vmul.f32 %v2708_v49, %v74_v9  ;;  %v1025_v9 = vld [vmem:[%s3566_s4 + $0x78] sm:$0xff] }
 0x1b1   :  { %v970_v48 = vmax.f32 %v954_v53, 0.0  ;;  %1119 = vperm.xlu0 %2204, %v1025_v9   ;;  %v1032_v9 = vld [vmem:[%s3566_s4 + $0xb0] sm:$0xff] }
 0x1b3   :  { %v2976_v45 = vpop.permute.xlu1 %178  ;;  %2198 = vset.pattern.permute.xlu1 %v3620_v56  ;;  %2000 = vmatprep.subr.mxu0 %v970_v48 }
 0x1b4   :  { %771 = vperm.xlu1 %2198, %v3641_v7   ;;  %2001 = vmatpush3.msra.mxu0 %v970_v48  ;;  %v353_v7 = vadd.f32 %v337_v20, %v253_v10  ;;  %v1022_v20 = vld [vmem:[%s3566_s4 + $0x60] sm:$0xff] }
 0x1b5   :  { %1189 = vperm.xlu0 %2204, %v1039_v11   ;;  %v1038_v10 = vld [vmem:[%s3566_s4 + $0xe0] sm:$0xff] }
 0x1b6   :  { %v453_v32 = vadd.f32 %v437_v2, %v353_v7  ;;  %v1021_v2 = vld [vmem:[%s3566_s4 + $0x58] sm:$0xff] }
 0x1b8   :  { %v2982_v16 = vpop.permute.xlu1 %375  ;;  %2199 = vset.pattern.permute.xlu1 %v3655_v42  ;;  %v553_v59 = vadd.f32 %v537_v33, %v453_v32  ;;  %v1037_v33 = vld [vmem:[%s3566_s4 + $0xd8] sm:$0xff]  ;;  %v1020_v32 = vld [vmem:[%s3566_s4 + $0x50] sm:$0xff] }
 0x1b9   :  { %875 = vperm.xlu1 %2199, %v2400_v21   ;;  %v3665_v21 = vld [vmem:[#allocation25_spill] sm:$0xff]  ;;  %1184 = vperm.xlu0 %2204, %v1038_v10  }
 0x1ba   :  { %v637_v13 = vmul.f32 %v2751_v39, %v3665_v21 }
 0x1bc   :  { %v653_v26 = vadd.f32 %v637_v13, %v553_v59  ;;  %v1036_v13 = vld [vmem:[%s3566_s4 + $0xd0] sm:$0xff]  ;;  %v1019_v59 = vld [vmem:[%s3566_s4 + $0x48] sm:$0xff] }
 0x1bd   :  { %v2991_v57 = vpop.permute.xlu1 %479  ;;  %2200 = vset.pattern.permute.xlu1 %v3620_v56  ;;  %1179 = vperm.xlu0 %2204, %v1037_v33   ;;  %v3672_v33 = vld [vmem:[#allocation26_spill] sm:$0xff] }
 0x1be   :  { %767 = vperm.xlu1 %2200, %v2416_v24   ;;  %v753_v51 = vadd.f32 %v737_v52, %v653_v26  ;;  %v1035_v26 = vld [vmem:[%s3566_s4 + $0xc8] sm:$0xff] }
 0x1c1   :  { %1174 = vperm.xlu0 %2204, %v1036_v13  }
 0x1c2   :  { %v2999_v29 = vpop.permute.xlu1 %687  ;;  %763 = vperm.xlu1 %2200, %v3639_v14  }
 0x1c5   :  { %1169 = vperm.xlu0 %2204, %v1035_v26   ;;  %v1013_v26 = vld [vmem:[%s3566_s4 + $0x18] sm:$0xff] }
 0x1c6   :  { %2202 = vset.pattern.permute.xlu1 %v3655_v42 }
 0x1c7   :  { %v792_v56 = vpop.permute.xlu1 %791  ;;  %867 = vperm.xlu1 %2202, %v2416_v24   ;;  %v1041_v24 = vld [vmem:[%s3566_s4 + $0xf8] sm:$0xff] }
 0x1c8   :  { %v837_v37 = vmul.f32 %v2773_v30, %v792_v56  ;;  %v1018_v56 = vld [vmem:[%s3566_s4 + $0x40] sm:$0xff] }
 0x1ca   :  { %v853_v17 = vadd.f32 %v837_v37, %v753_v51  ;;  %v1017_v37 = vld [vmem:[%s3566_s4 + $0x38] sm:$0xff] }
 0x1cb   :  { %2203 = vset.pattern.permute.xlu1 %v3621_v61  ;;  %v331_v61 = vmul.f32 %v2714_v12, %v3667_v62  ;;  %v1016_v62 = vld [vmem:[%s3566_s4 + $0x30] sm:$0xff] }
 0x1cc   :  { %v69_v14 = vpop.permute.xlu1 %68  ;;  %v953_v50 = vadd.f32 %v937_v41, %v853_v17  ;;  %1199 = vperm.xlu1 %2203, %v1041_v24   ;;  %v1034_v41 = vld [vmem:[%s3566_s4 + $0xc0] sm:$0xff]  ;;  %v3669_v17 = vld [vmem:[#allocation43_spill] sm:$0xff] }
 0x1cd   :  { %v150_v22 = vmul.f32 %v2708_v49, %v69_v14  ;;  %1164 = vperm.xlu0 %2204, %v1034_v41   ;;  %v430_v4 = vmul.f32 %v2727_v58, %v3669_v17 }
 0x1ce   :  { %v969_v42 = vmax.f32 %v953_v50, 0.0 }
 0x1d0   :  { %v174_v63 = vpop.permute.xlu1 %173  ;;  %2002 = vmatprep.subr.mxu0 %v969_v42  ;;  %1194 = vperm.xlu1 %2203, %v1040_v18   ;;  %v530_v18 = vmul.f32 %v2737_v47, %v2787_v3  ;;  %v436_v3 = vmul.f32 %v2727_v58, %v2879_v8  ;;  %v1031_v8 = vld [vmem:[%s3566_s4 + $0xa8] sm:$0xff] }
 0x1d1   :  { %v247_v44 = vadd.f32 %v174_v63, %v151_v38  ;;  %2003 = vmatpush3.msra.mxu0 %v969_v42  ;;  %v3670_v42 = vld [vmem:[#allocation44_spill] sm:$0xff]  ;;  %v1033_v63 = vld [vmem:[%s3566_s4 + $0xb8] sm:$0xff] }
 0x1d2   :  { %v156_v14 = vmul.f32 %v2708_v49, %v3670_v42  ;;  %1159 = vperm.xlu0 %2204, %v1033_v63   ;;  %v1011_v42 = vld [vmem:[%s3566_s4 + $0x8] sm:$0xff] }
 0x1d3   :  { %v347_v60 = vadd.f32 %v331_v61, %v247_v44  ;;  %v3671_v61 = vld [vmem:[#allocation11_spill] sm:$0xff] }
 0x1d4   :  { %1114 = vperm.xlu1 %2203, %v1024_v28   ;;  %v336_v46 = vmul.f32 %v2714_v12, %v3671_v61  ;;  %v1027_v61 = vld [vmem:[%s3566_s4 + $0x88] sm:$0xff] }
 0x1d5   :  { %v3026_v53 = vpop.permute.xlu1 %371  ;;  %v3028_v48 = vadd.f32 %v431_v23, %v347_v60  ;;  %v252_v23 = vadd.f32 %v2837_v43, %v156_v14  ;;  %v536_v43 = vmul.f32 %v2737_v47, %v2925_v25  ;;  %v736_v25 = vmul.f32 %v2765_v27, %v2999_v29  ;;  %v1029_v29 = vld [vmem:[%s3566_s4 + $0x98] sm:$0xff]  ;;  %v3673_v14 = vld [vmem:[#allocation12_spill] sm:$0xff] }
 0x1d6   :  { %1154 = vperm.xlu0 %2204, %v1032_v9   ;;  %v1505_v9 = vld [vmem:[%s3568_s6 + $0x70] sm:$0xff] }
 0x1d7   :  { %v352_v11 = vadd.f32 %v336_v46, %v252_v23  ;;  %v1010_v46 = vld [vmem:[%s3566_s4] sm:$0xff] }
 0x1d8   :  { %1109 = vperm.xlu1 %2203, %v1023_v19   ;;  %v1015_v19 = vld [vmem:[%s3566_s4 + $0x28] sm:$0xff] }
 0x1d9   :  { %v452_v10 = vadd.f32 %v436_v3, %v352_v11 }
 0x1da   :  { %v3039_v34 = vpop.permute.xlu1 %475  ;;  %1149 = vperm.xlu0 %2204, %v1031_v8  }
 0x1db   :  { %v552_v13 = vadd.f32 %v536_v43, %v452_v10 }
 0x1dc   :  { %1104 = vperm.xlu1 %2203, %v1022_v20  }
 0x1df   :  { %v3050_v7 = vpop.permute.xlu1 %683 }
 0x1e0   :  { %1099 = vperm.xlu1 %2203, %v1021_v2   ;;  %v1014_v2 = vld [vmem:[%s3566_s4 + $0x20] sm:$0xff]  ;;  %v735_v10 = vmul.f32 %v2765_v27, %v3050_v7 }
 0x1e4   :  { %v788_v21 = vpop.permute.xlu1 %787  ;;  %1094 = vperm.xlu1 %2203, %v1020_v32   ;;  %v636_v32 = vmul.f32 %v2751_v39, %v3672_v33  ;;  %v1503_v33 = vld [vmem:[%s3568_s6 + $0x60] sm:$0xff] }
 0x1e8   :  { %1089 = vperm.xlu1 %2203, %v1019_v59  }
 0x1e9   :  { %v169_v52 = vpop.permute.xlu1 %168 }
 0x1ea   :  { %v246_v50 = vadd.f32 %v169_v52, %v150_v22  ;;  %v1030_v52 = vld [vmem:[%s3566_s4 + $0xa0] sm:$0xff]  ;;  %v836_v22 = vmul.f32 %v2773_v30, %v788_v21  ;;  %v1028_v21 = vld [vmem:[%s3566_s4 + $0x90] sm:$0xff] }
 0x1eb   :  { %1144 = vperm.xlu0 %2204, %v1030_v52   ;;  %v3675_v52 = vld [vmem:[#allocation13_spill] sm:$0xff] }
 0x1ec   :  { %1084 = vperm.xlu1 %2203, %v1018_v56   ;;  %v652_v56 = vadd.f32 %v636_v32, %v552_v13  ;;  %v334_v7 = vmul.f32 %v2714_v12, %v3675_v52 }
 0x1ee   :  { %v264_v51 = vpop.permute.xlu1 %263  ;;  %v752_v41 = vadd.f32 %v736_v25, %v652_v56  ;;  %v1504_v25 = vld [vmem:[%s3568_s6 + $0x68] sm:$0xff] }
 0x1ef   :  { %v330_v24 = vmul.f32 %v2714_v12, %v264_v51  ;;  %1139 = vperm.xlu0 %2204, %v1029_v29  }
 0x1f0   :  { %1079 = vperm.xlu1 %2203, %v1017_v37   ;;  %v1012_v37 = vld [vmem:[%s3566_s4 + $0x10] sm:$0xff]  ;;  %v852_v17 = vadd.f32 %v836_v22, %v752_v41  ;;  %v3188_v41 = vpop.permute.xlu0 %775 }
 0x1f1   :  { %v346_v38 = vadd.f32 %v330_v24, %v246_v50  ;;  %v155_v50 = vmul.f32 %v2708_v49, %v2833_v54  ;;  %v435_v54 = vmul.f32 %v2727_v58, %v2916_v6  ;;  %v1026_v6 = vld [vmem:[%s3566_s4 + $0x80] sm:$0xff] }
 0x1f3   :  { %v446_v44 = vadd.f32 %v430_v4, %v346_v38  ;;  %v3093_v28 = vpop.permute.xlu1 %471  ;;  %1134 = vperm.xlu0 %2204, %v1028_v21   ;;  %v251_v38 = vadd.f32 %v2873_v31, %v155_v50  ;;  %v535_v31 = vmul.f32 %v2737_v47, %v2959_v1  ;;  %v1506_v1 = vld [vmem:[%s3568_s6 + $0x78] sm:$0xff]  ;;  %v1499_v50 = vld [vmem:[%s3568_s6 + $0x40] sm:$0xff] }
 0x1f4   :  { %1074 = vperm.xlu1 %2203, %v1016_v62  }
 0x1f5   :  { %v3097_v60 = vadd.f32 %v530_v18, %v446_v44  ;;  %v335_v18 = vmul.f32 %v2714_v12, %v3673_v14 }
 0x1f7   :  { %1129 = vperm.xlu0 %2204, %v1027_v61   ;;  %v351_v23 = vadd.f32 %v335_v18, %v251_v38  ;;  %v680_v18 = vpop.permute.xlu0 %679 }
 0x1f8   :  { %v3107_v20 = vpop.permute.xlu1 %575  ;;  %1069 = vperm.xlu1 %2203, %v1015_v19   ;;  %v3674_v19 = vld [vmem:[#allocation28_spill] sm:$0xff] }
 0x1f9   :  { %v451_v3 = vadd.f32 %v435_v54, %v351_v23  ;;  %v635_v11 = vmul.f32 %v2751_v39, %v3674_v19  ;;  %v1498_v54 = vld [vmem:[%s3568_s6 + $0x38] sm:$0xff]  ;;  %v152_v19 = vmul.f32 %v2708_v49, %v2941_v55  ;;  %v1493_v55 = vld [vmem:[%s3568_s6 + $0x10] sm:$0xff] }
 0x1fb   :  { %1124 = vperm.xlu0 %2204, %v1026_v6   ;;  %v551_v43 = vadd.f32 %v535_v31, %v451_v3  ;;  %v153_v31 = vmul.f32 %v2708_v49, %v2906_v15  ;;  %v676_v6 = vpop.permute.xlu0 %675  ;;  %v3677_v15 = vld [vmem:[#allocation15_spill] sm:$0xff] }
 0x1fc   :  { %1064 = vperm.xlu1 %2203, %v1014_v2   ;;  %v154_v2 = vmul.f32 %v2708_v49, %v2869_v0  ;;  %v434_v0 = vmul.f32 %v2727_v58, %v2950_v5 }
 0x1fd   :  { %v784_v59 = vpop.permute.xlu1 %783  ;;  %v651_v32 = vadd.f32 %v635_v11, %v551_v43  ;;  %v249_v11 = vadd.f32 %v2944_v36, %v153_v31  ;;  %v1496_v43 = vld [vmem:[%s3568_s6 + $0x28] sm:$0xff]  ;;  %v3678_v36 = vld [vmem:[#allocation16_spill] sm:$0xff] }
 0x1fe   :  { %v835_v13 = vmul.f32 %v2773_v30, %v784_v59  ;;  %v1501_v59 = vld [vmem:[%s3568_s6 + $0x50] sm:$0xff] }
 0x1ff   :  { %1584 = vperm.xlu0 %2204, %v1506_v1   ;;  %v751_v56 = vadd.f32 %v735_v10, %v651_v32  ;;  %v333_v10 = vmul.f32 %v2714_v12, %v3677_v15 }
 0x200   :  { %1059 = vperm.xlu1 %2203, %v1013_v26   ;;  %v250_v26 = vadd.f32 %v2910_v35, %v154_v2  ;;  %v1502_v35 = vld [vmem:[%s3568_s6 + $0x58] sm:$0xff]  ;;  %v433_v2 = vmul.f32 %v2727_v58, %v2982_v16  ;;  %v533_v16 = vmul.f32 %v2737_v47, %v3039_v34 }
 0x201   :  { %v851_v29 = vadd.f32 %v835_v13, %v751_v56  ;;  %v668_v13 = vpop.permute.xlu0 %667  ;;  %v349_v52 = vadd.f32 %v333_v10, %v249_v11 }
 0x202   :  { %v888_v51 = vpop.permute.xlu1 %887 }
 0x203   :  { %v936_v4 = vmul.f32 %v2793_v40, %v888_v51  ;;  %1574 = vperm.xlu0 %2204, %v1504_v25   ;;  %v332_v25 = vmul.f32 %v2714_v12, %v3678_v36  ;;  %v633_v12 = vmul.f32 %v2751_v39, %v3107_v20  ;;  %v733_v20 = vmul.f32 %v2765_v27, %v676_v6 }
 0x204   :  { %1054 = vperm.xlu1 %2203, %v1012_v37   ;;  %v350_v37 = vadd.f32 %v334_v7, %v250_v26  ;;  %v1494_v7 = vld [vmem:[%s3568_s6 + $0x18] sm:$0xff] }
 0x205   :  { %v952_v24 = vadd.f32 %v936_v4, %v852_v17  ;;  %v534_v17 = vmul.f32 %v2737_v47, %v2991_v57  ;;  %v3676_v57 = vld [vmem:[#allocation30_spill] sm:$0xff] }
 0x206   :  { %v450_v4 = vadd.f32 %v434_v0, %v350_v37  ;;  %v634_v38 = vmul.f32 %v2751_v39, %v3676_v57  ;;  %v449_v0 = vadd.f32 %v433_v2, %v349_v52  ;;  %v979_v52 = vld [vmem:[%s3565_s3 + $0x8] sm:$0xff] }
 0x207   :  { %v968_v63 = vmax.f32 %v952_v24, 0.0  ;;  %v3144_v62 = vpop.permute.xlu1 %467  ;;  %1564 = vperm.xlu0 %2204, %v1502_v35  }
 0x208   :  { %1049 = vperm.xlu1 %2203, %v1011_v42   ;;  %v1500_v42 = vld [vmem:[%s3568_s6 + $0x48] sm:$0xff]  ;;  %v550_v14 = vadd.f32 %v534_v17, %v450_v4 }
 0x209   :  { %2004 = vmatprep.subr.mxu0 %v968_v63 }
 0x20a   :  { %2005 = vmatpush3.msra.mxu0 %v968_v63  ;;  %v1497_v63 = vld [vmem:[%s3568_s6 + $0x30] sm:$0xff]  ;;  %v650_v61 = vadd.f32 %v634_v38, %v550_v14  ;;  %v833_v14 = vmul.f32 %v2773_v30, %v3188_v41 }
 0x20b   :  { %1554 = vperm.xlu0 %2204, %v1500_v42  }
 0x20c   :  { %v3159_v44 = vpop.permute.xlu1 %571  ;;  %1044 = vperm.xlu1 %2203, %v1010_v46   ;;  %v734_v46 = vmul.f32 %v2765_v27, %v680_v18 }
 0x20d   :  { %v632_v35 = vmul.f32 %v2751_v39, %v3159_v44  ;;  %v1749_v44 = vld [vmem:[%s3570_s8] sm:$0xff] }
 0x20e   :  { %v750_v1 = vadd.f32 %v734_v46, %v650_v61 }
 0x20f   :  { %1544 = vperm.xlu0 %2204, %v1498_v54  }
 0x210   :  { %1579 = vperm.xlu1 %2203, %v1505_v9   ;;  %v1495_v9 = vld [vmem:[%s3568_s6 + $0x20] sm:$0xff] }
 0x211   :  { %v780_v8 = vpop.permute.xlu1 %779 }
 0x212   :  { %v834_v3 = vmul.f32 %v2773_v30, %v780_v8  ;;  %v248_v8 = vadd.f32 %v2976_v45, %v152_v19  ;;  %v432_v45 = vmul.f32 %v2727_v58, %v3026_v53  ;;  %v664_v58 = vpop.permute.xlu0 %663  ;;  %v1491_v53 = vld [vmem:[%s3568_s6] sm:$0xff] }
 0x213   :  { %1534 = vperm.xlu0 %2204, %v1496_v43  }
 0x214   :  { %1569 = vperm.xlu1 %2203, %v1503_v33   ;;  %v850_v32 = vadd.f32 %v834_v3, %v750_v1  ;;  %v348_v56 = vadd.f32 %v332_v25, %v248_v8  ;;  %v730_v1 = vmul.f32 %v2765_v27, %v664_v58  ;;  %v992_v58 = vld [vmem:[%s3565_s3 + $0x70] sm:$0xff] }
 0x216   :  { %v884_v22 = vpop.permute.xlu1 %883  ;;  %v448_v34 = vadd.f32 %v432_v45, %v348_v56  ;;  %v872_v42 = vpop.permute.xlu0 %871  ;;  %v982_v45 = vld [vmem:[%s3565_s3 + $0x20] sm:$0xff] }
 0x217   :  { %v935_v51 = vmul.f32 %v2793_v40, %v884_v22  ;;  %v532_v22 = vmul.f32 %v2737_v47, %v3093_v28  ;;  %1524 = vperm.xlu0 %2204, %v1494_v7   ;;  %v1492_v28 = vld [vmem:[%s3568_s6 + $0x8] sm:$0xff]  ;;  %v984_v7 = vld [vmem:[%s3565_s3 + $0x30] sm:$0xff]  ;;  %v986_v56 = vld [vmem:[%s3565_s3 + $0x40] sm:$0xff] }
 0x218   :  { %1559 = vperm.xlu1 %2203, %v1501_v59  }
 0x219   :  { %v951_v5 = vadd.f32 %v935_v51, %v851_v29  ;;  %v549_v51 = vadd.f32 %v533_v16, %v449_v0  ;;  %v548_v37 = vadd.f32 %v532_v22, %v448_v34  ;;  %v983_v16 = vld [vmem:[%s3565_s3 + $0x28] sm:$0xff]  ;;  %v988_v22 = vld [vmem:[%s3565_s3 + $0x50] sm:$0xff]  ;;  %v994_v34 = vld [vmem:[%s3565_s3 + $0x80] sm:$0xff] }
 0x21a   :  { %v987_v0 = vld [vmem:[%s3565_s3 + $0x48] sm:$0xff] }
 0x21b   :  { %v967_v24 = vmax.f32 %v951_v5, 0.0  ;;  %v3199_v21 = vpop.permute.xlu1 %567  ;;  %v649_v17 = vadd.f32 %v633_v12, %v549_v51  ;;  %1514 = vperm.xlu0 %2204, %v1492_v28   ;;  %v648_v4 = vadd.f32 %v632_v35, %v548_v37  ;;  %v989_v12 = vld [vmem:[%s3565_s3 + $0x58] sm:$0xff]  ;;  %v995_v51 = vld [vmem:[%s3565_s3 + $0x88] sm:$0xff]  ;;  %v996_v35 = vld [vmem:[%s3565_s3 + $0x90] sm:$0xff] }
 0x21c   :  { %1549 = vperm.xlu1 %2203, %v1499_v50   ;;  %v631_v41 = vmul.f32 %v2751_v39, %v3199_v21  ;;  %v997_v28 = vld [vmem:[%s3565_s3 + $0x98] sm:$0xff]  ;;  %v999_v37 = vld [vmem:[%s3565_s3 + $0xa8] sm:$0xff] }
 0x21d   :  { %2006 = vmatprep.subr.mxu0 %v967_v24  ;;  %v749_v18 = vadd.f32 %v733_v20, %v649_v17  ;;  %v998_v20 = vld [vmem:[%s3565_s3 + $0xa0] sm:$0xff]  ;;  %v1000_v17 = vld [vmem:[%s3565_s3 + $0xb0] sm:$0xff] }
 0x21e   :  { %2007 = vmatpush3.msra.mxu0 %v967_v24 }
 0x21f   :  { %1752 = vperm.xlu0 %2204, %v1749_v44   ;;  %v849_v61 = vadd.f32 %v833_v14, %v749_v18  ;;  %v1004_v44 = vld [vmem:[%s3565_s3 + $0xd0] sm:$0xff]  ;;  %v1007_v14 = vld [vmem:[%s3565_s3 + $0xe8] sm:$0xff] }
 0x220   :  { %v672_v23 = vpop.permute.xlu1 %671  ;;  %1539 = vperm.xlu1 %2203, %v1497_v63   ;;  %v932_v63 = vmul.f32 %v2793_v40, %v872_v42  ;;  %v1006_v42 = vld [vmem:[%s3565_s3 + $0xe0] sm:$0xff]  ;;  %v1008_v18 = vld [vmem:[%s3565_s3 + $0xf0] sm:$0xff] }
 0x221   :  { %v732_v5 = vmul.f32 %v2765_v27, %v672_v23  ;;  %v531_v23 = vmul.f32 %v2737_v47, %v3144_v62  ;;  %v731_v47 = vmul.f32 %v2765_v27, %v668_v13 }
 0x223   :  { %v748_v57 = vadd.f32 %v732_v5, %v648_v4  ;;  %v547_v11 = vadd.f32 %v531_v23, %v3028_v48  ;;  %v1001_v5 = vld [vmem:[%s3565_s3 + $0xb8] sm:$0xff]  ;;  %v1002_v4 = vld [vmem:[%s3565_s3 + $0xc0] sm:$0xff] }
 0x224   :  { %1529 = vperm.xlu1 %2203, %v1495_v9  }
 0x225   :  { %v880_v33 = vpop.permute.xlu1 %879  ;;  %v647_v10 = vadd.f32 %v631_v41, %v547_v11 }
 0x226   :  { %v934_v49 = vmul.f32 %v2793_v40, %v880_v33 }
 0x227   :  { %v747_v48 = vadd.f32 %v731_v47, %v647_v10 }
 0x228   :  { %v950_v26 = vadd.f32 %v934_v49, %v850_v32  ;;  %1519 = vperm.xlu1 %2203, %v1493_v55  }
 0x22a   :  { %v966_v59 = vmax.f32 %v950_v26, 0.0  ;;  %v564_v29 = vpop.permute.xlu1 %563  ;;  %v985_v26 = vld [vmem:[%s3565_s3 + $0x38] sm:$0xff] }
 0x22b   :  { %v630_v31 = vmul.f32 %v2751_v39, %v564_v29  ;;  %v864_v39 = vpop.permute.xlu0 %863  ;;  %v991_v29 = vld [vmem:[%s3565_s3 + $0x68] sm:$0xff] }
 0x22c   :  { %2008 = vmatprep.subr.mxu0 %v966_v59  ;;  %1509 = vperm.xlu1 %2203, %v1491_v53   ;;  %v993_v53 = vld [vmem:[%s3565_s3 + $0x78] sm:$0xff] }
 0x22d   :  { %2009 = vmatpush3.msra.mxu0 %v966_v59  ;;  %v646_v43 = vadd.f32 %v630_v31, %v3097_v60  ;;  %v930_v60 = vmul.f32 %v2793_v40, %v864_v39  ;;  %v990_v59 = vld [vmem:[%s3565_s3 + $0x60] sm:$0xff] }
 0x22f   :  { %v772_v50 = vpop.permute.xlu1 %771  ;;  %v746_v21 = vadd.f32 %v730_v1, %v646_v43  ;;  %v1120_v23 = vpop.permute.xlu0 %1119 }
 0x230   :  { %v832_v24 = vmul.f32 %v2773_v30, %v772_v50  ;;  %v1003_v50 = vld [vmem:[%s3565_s3 + $0xc8] sm:$0xff] }
 0x232   :  { %v848_v38 = vadd.f32 %v832_v24, %v748_v57  ;;  %v1005_v24 = vld [vmem:[%s3565_s3 + $0xd8] sm:$0xff] }
 0x233   :  { %v1009_v57 = vld [vmem:[%s3565_s3 + $0xf8] sm:$0xff] }
 0x234   :  { %v876_v54 = vpop.permute.xlu1 %875  ;;  %v948_v6 = vadd.f32 %v932_v63, %v848_v38  ;;  %v1460_v38 = vld [vmem:[%s3567_s5 + $0x8] sm:$0xff] }
 0x235   :  { %v933_v46 = vmul.f32 %v2793_v40, %v876_v54  ;;  %1651 = vmatprep.mubr.f32.mxu1 %v1460_v38 }
 0x236   :  { %v964_v15 = vmax.f32 %v948_v6, 0.0 }
 0x237   :  { %v949_v3 = vadd.f32 %v933_v46, %v849_v61 }
 0x239   :  { %v965_v9 = vmax.f32 %v949_v3, 0.0  ;;  %v768_v19 = vpop.permute.xlu1 %767 }
 0x23a   :  { %v831_v2 = vmul.f32 %v2773_v30, %v768_v19 }
 0x23b   :  { %2010 = vmatprep.subr.mxu0 %v965_v9 }
 0x23c   :  { %2011 = vmatpush3.msra.mxu0 %v965_v9  ;;  %v847_v49 = vadd.f32 %v831_v2, %v747_v48  ;;  %v1190_v9 = vpop.permute.xlu0 %1189 }
 0x23d   :  { %v764_v62 = vpop.permute.xlu1 %763  ;;  %2012 = vmatprep.subr.mxu0 %v964_v15 }
 0x23e   :  { %v830_v8 = vmul.f32 %v2773_v30, %v764_v62  ;;  %2013 = vmatpush3.msra.mxu0 %v964_v15  ;;  %v980_v30 = vld [vmem:[%s3565_s3 + $0x10] sm:$0xff] }
 0x240   :  { %v846_v33 = vadd.f32 %v830_v8, %v746_v21  ;;  %v1185_v15 = vpop.permute.xlu0 %1184 }
 0x242   :  { %v868_v32 = vpop.permute.xlu1 %867  ;;  %v946_v36 = vadd.f32 %v930_v60, %v846_v33 }
 0x243   :  { %v931_v55 = vmul.f32 %v2793_v40, %v868_v32  ;;  %v981_v40 = vld [vmem:[%s3565_s3 + $0x18] sm:$0xff] }
 0x244   :  { %v962_v13 = vmax.f32 %v946_v36, 0.0  ;;  %v1180_v39 = vpop.permute.xlu0 %1179 }
 0x245   :  { %v947_v25 = vadd.f32 %v931_v55, %v847_v49 }
 0x247   :  { %v963_v27 = vmax.f32 %v947_v25, 0.0  ;;  %v1200_v63 = vpop.permute.xlu1 %1199 }
 0x248   :  { %v1175_v60 = vpop.permute.xlu0 %1174 }
 0x249   :  { %2014 = vmatprep.subr.mxu0 %v963_v27 }
 0x24a   :  { %2015 = vmatpush3.msra.mxu0 %v963_v27 }
 0x24b   :  { %2016 = vmatprep.subr.mxu0 %v962_v13  ;;  %v1195_v54 = vpop.permute.xlu1 %1194 }
 0x24c   :  { %2017 = vmatpush3.msra.mxu0 %v962_v13  ;;  %v1170_v25 = vpop.permute.xlu0 %1169 }
 0x24d   :  { %2019 = vmatmul.mubr.f32.vlgmr.msra.gmra.mxu0 %v979_v52 }
 0x24e   :  { %2021 = vmatprep.mubr.f32.mxu0 %v980_v30 }
 0x24f   :  { %v1115_v6 = vpop.permute.xlu1 %1114 }
 0x251   :  { %2022 = vmatmul.mubr.f32.gmra.mxu0 %v981_v40  ;;  %v1165_v40 = vpop.permute.xlu0 %1164 }
 0x252   :  { %2024 = vmatprep.mubr.f32.mxu0 %v982_v45 }
 0x253   :  { %v1110_v11 = vpop.permute.xlu1 %1109 }
 0x255   :  { %2025 = vmatmul.mubr.f32.gmra.mxu0 %v983_v16 }
 0x256   :  { %2027 = vmatprep.mubr.f32.mxu0 %v984_v7 }
 0x257   :  { %v1105_v47 = vpop.permute.xlu1 %1104 }
 0x259   :  { %2028 = vmatmul.mubr.f32.gmra.mxu0 %v985_v26 }
 0x25a   :  { %2030 = vmatprep.mubr.f32.mxu0 %v986_v56  ;;  %v1160_v56 = vpop.permute.xlu0 %1159 }
 0x25b   :  { %v1100_v2 = vpop.permute.xlu1 %1099 }
 0x25d   :  { %2031 = vmatmul.mubr.f32.gmra.mxu0 %v987_v0 }
 0x25e   :  { %2033 = vmatprep.mubr.f32.mxu0 %v988_v22 }
 0x25f   :  { %v1095_v49 = vpop.permute.xlu1 %1094 }
 0x261   :  { %2034 = vmatmul.mubr.f32.gmra.mxu0 %v989_v12 }
 0x262   :  { %2036 = vmatprep.mubr.f32.mxu0 %v990_v59 }
 0x263   :  { %v1090_v13 = vpop.permute.xlu1 %1089 }
 0x265   :  { %2037 = vmatmul.mubr.f32.gmra.mxu0 %v991_v29  ;;  %v1155_v29 = vpop.permute.xlu0 %1154 }
 0x266   :  { %2039 = vmatprep.mubr.f32.mxu0 %v992_v58 }
 0x267   :  { %v1085_v16 = vpop.permute.xlu1 %1084 }
 0x269   :  { %2040 = vmatmul.mubr.f32.gmra.mxu0 %v993_v53 }
 0x26a   :  { %2042 = vmatprep.mubr.f32.mxu0 %v994_v34 }
 0x26b   :  { %v1080_v22 = vpop.permute.xlu1 %1079 }
 0x26d   :  { %2043 = vmatmul.mubr.f32.gmra.mxu0 %v995_v51 }
 0x26e   :  { %2045 = vmatprep.mubr.f32.mxu0 %v996_v35  ;;  %v1150_v35 = vpop.permute.xlu0 %1149 }
 0x26f   :  { %v1075_v53 = vpop.permute.xlu1 %1074 }
 0x271   :  { %2046 = vmatmul.mubr.f32.gmra.mxu0 %v997_v28 }
 0x272   :  { %2048 = vmatprep.mubr.f32.mxu0 %v998_v20 }
 0x273   :  { %v1070_v20 = vpop.permute.xlu1 %1069 }
 0x275   :  { %2049 = vmatmul.mubr.f32.gmra.mxu0 %v999_v37 }
 0x276   :  { %2051 = vmatprep.mubr.f32.mxu0 %v1000_v17 }
 0x277   :  { %v1065_v38 = vpop.permute.xlu1 %1064 }
 0x279   :  { %2052 = vmatmul.mubr.f32.gmra.mxu0 %v1001_v5 }
 0x27a   :  { %2054 = vmatprep.mubr.f32.mxu0 %v1002_v4 }
 0x27d   :  { %2055 = vmatmul.mubr.f32.gmra.mxu0 %v1003_v50 }
 0x27e   :  { %2057 = vmatprep.mubr.f32.mxu0 %v1004_v44 }
 0x281   :  { %2058 = vmatmul.mubr.f32.gmra.mxu0 %v1005_v24 }
 0x282   :  { %2060 = vmatprep.mubr.f32.mxu0 %v1006_v42 }
 0x285   :  { %2061 = vmatmul.mubr.f32.gmra.mxu0 %v1007_v14  ;;  %v1145_v14 = vpop.permute.xlu0 %1144 }
 0x286   :  { %2063 = vmatprep.mubr.f32.mxu0 %v1008_v18 }
 0x289   :  { %2064 = vmatmul.mubr.f32.gmra.mxu0 %v1009_v57 }
 0x30d   :  { %v3374_v61 = vpop.f32.mrf.mxu0 }
 0x30e   :  { %3679 = vst [vmem:[#allocation22_spill] sm:$0xff] %v3374_v61 }
 0x30f   :  { %v3376_v46 = vpop.f32.mrf.mxu0 }
 0x310   :  { %3680 = vst [vmem:[#allocation32_spill] sm:$0xff] %v3376_v46 }
 0x311   :  { %v3378_v31 = vpop.f32.mrf.mxu0 }
 0x313   :  { %v3380_v3 = vpop.f32.mrf.mxu0 }
 0x314   :  { %3681 = vst [vmem:[#allocation19_spill] sm:$0xff] %v3380_v3 }
 0x315   :  { %v3382_v41 = vpop.f32.mrf.mxu0 }
 0x317   :  { %v3384_v19 = vpop.f32.mrf.mxu0 }
 0x319   :  { %v3386_v43 = vpop.f32.mrf.mxu0 }
 0x31b   :  { %v3388_v1 = vpop.f32.mrf.mxu0 }
 0x31d   :  { %v3390_v10 = vpop.f32.mrf.mxu0 }
 0x31f   :  { %v3392_v62 = vpop.f32.mrf.mxu0 }
 0x321   :  { %v2035_v8 = vpop.f32.mrf.mxu0 }
 0x323   :  { %v1318_v21 = vpop.f32.mrf.mxu0 }
 0x325   :  { %v2038_v48 = vpop.f32.mrf.mxu0 }
 0x326   :  { %v1334_v18 = vadd.f32 %v2038_v48, %v1110_v11  ;;  %v1060_v48 = vpop.permute.xlu1 %1059 }
 0x327   :  { %v1328_v33 = vpop.f32.mrf.mxu0 }
 0x328   :  { %v1329_v61 = vadd.f32 %v1328_v33, %v1105_v47  ;;  %v1314_v47 = vadd.f32 %v3390_v10, %v1090_v13 }
 0x329   :  { %v2041_v32 = vpop.f32.mrf.mxu0 }
 0x32a   :  { %v1344_v37 = vadd.f32 %v2041_v32, %v1120_v23  ;;  %v1324_v23 = vadd.f32 %v2035_v8, %v1100_v2  ;;  %v1319_v32 = vadd.f32 %v1318_v21, %v1095_v49  ;;  %v1439_v11 = vmax.f32 %v1329_v61, 0.0 }
 0x32b   :  { %v1338_v55 = vpop.f32.mrf.mxu0  ;;  %v1309_v8 = vadd.f32 %v3392_v62, %v1085_v16  ;;  %v1304_v21 = vadd.f32 %v3386_v43, %v1080_v22  ;;  %v1436_v49 = vmax.f32 %v1314_v47, 0.0  ;;  %v1469_v47 = vld [vmem:[%s3567_s5 + $0x50] sm:$0xff] }
 0x32c   :  { %v1339_v4 = vadd.f32 %v1338_v55, %v1115_v6  ;;  %v1442_v57 = vmax.f32 %v1344_v37, 0.0  ;;  %v1438_v33 = vmax.f32 %v1324_v23, 0.0  ;;  %v1437_v2 = vmax.f32 %v1319_v32, 0.0  ;;  %v1459_v23 = vld [vmem:[%s3567_s5] sm:$0xff]  ;;  %v1466_v32 = vld [vmem:[%s3567_s5 + $0x38] sm:$0xff] }
 0x32d   :  { %v3394_v36 = vpop.f32.mrf.mxu0  ;;  %v1435_v13 = vmax.f32 %v1309_v8, 0.0  ;;  %v1434_v16 = vmax.f32 %v1304_v21, 0.0  ;;  %v1473_v8 = vld [vmem:[%s3567_s5 + $0x70] sm:$0xff]  ;;  %v1480_v21 = vld [vmem:[%s3567_s5 + $0xa8] sm:$0xff] }
 0x32e   :  { %3682 = vst [vmem:[#allocation7_spill] sm:$0xff] %v3394_v36  ;;  %v1441_v36 = vmax.f32 %v1339_v4, 0.0 }
 0x32f   :  { %v3396_v27 = vpop.f32.mrf.mxu0 }
 0x330   :  { %3683 = vst [vmem:[#allocation33_spill] sm:$0xff] %v3396_v27 }
 0x331   :  { %v3398_v52 = vpop.f32.mrf.mxu0 }
 0x333   :  { %v3400_v30 = vpop.f32.mrf.mxu0 }
 0x334   :  { %3684 = vst [vmem:[#allocation5_spill] sm:$0xff] %v3400_v30 }
 0x335   :  { %v3402_v45 = vpop.f32.mrf.mxu0 }
 0x336   :  { %v1374_v62 = vadd.f32 %v3402_v45, %v1150_v35  ;;  %v1284_v45 = vadd.f32 %v3378_v31, %v1060_v48  ;;  %v1468_v48 = vld [vmem:[%s3567_s5 + $0x48] sm:$0xff] }
 0x337   :  { %v3404_v7 = vpop.f32.mrf.mxu0 }
 0x338   :  { %v1369_v43 = vadd.f32 %v3404_v7, %v1145_v14  ;;  %v3686_v7 = vld [vmem:[#allocation19_spill] sm:$0xff] }
 0x339   :  { %v2053_v26 = vpop.f32.mrf.mxu0 }
 0x33b   :  { %v3406_v0 = vpop.f32.mrf.mxu0 }
 0x33c   :  { %v1379_v10 = vadd.f32 %v3406_v0, %v1155_v29  ;;  %v1289_v0 = vadd.f32 %v3384_v19, %v1065_v38  ;;  %v3687_v19 = vld [vmem:[#allocation7_spill] sm:$0xff] }
 0x33d   :  { %v2056_v12 = vpop.f32.mrf.mxu0 }
 0x33f   :  { %v1388_v59 = vpop.f32.mrf.mxu0 }
 0x341   :  { %v2059_v58 = vpop.f32.mrf.mxu0 }
 0x342   :  { %v1404_v3 = vadd.f32 %v2059_v58, %v1180_v39  ;;  %v1389_v39 = vadd.f32 %v1388_v59, %v1165_v40  ;;  %v1294_v40 = vadd.f32 %v3382_v41, %v1070_v20  ;;  %v1448_v59 = vmax.f32 %v1374_v62, 0.0  ;;  %v3685_v41 = vld [vmem:[#allocation5_spill] sm:$0xff]  ;;  %v1485_v62 = vld [vmem:[%s3567_s5 + $0xd0] sm:$0xff] }
 0x343   :  { %v1398_v34 = vpop.f32.mrf.mxu0 }
 0x344   :  { %v1399_v6 = vadd.f32 %v1398_v34, %v1175_v60  ;;  %v1454_v55 = vmax.f32 %v1404_v3, 0.0  ;;  %v1055_v3 = vpop.permute.xlu1 %1054  ;;  %v1432_v29 = vmax.f32 %v1294_v40, 0.0  ;;  %v1487_v40 = vld [vmem:[%s3567_s5 + $0xe0] sm:$0xff] }
 0x345   :  { %v2062_v51 = vpop.f32.mrf.mxu0  ;;  %v1279_v34 = vadd.f32 %v3686_v7, %v1055_v3  ;;  %v1482_v3 = vld [vmem:[%s3567_s5 + $0xb8] sm:$0xff] }
 0x346   :  { %v1414_v44 = vadd.f32 %v2062_v51, %v1190_v9  ;;  %v1431_v51 = vmax.f32 %v1289_v0, 0.0 }
 0x347   :  { %v1408_v28 = vpop.f32.mrf.mxu0 }
 0x348   :  { %v1409_v46 = vadd.f32 %v1408_v28, %v1185_v15  ;;  %v1456_v30 = vmax.f32 %v1414_v44, 0.0  ;;  %v1394_v15 = vadd.f32 %v2056_v12, %v1170_v25  ;;  %v1299_v25 = vadd.f32 %v3388_v1, %v1075_v53  ;;  %v1050_v1 = vpop.permute.xlu1 %1049  ;;  %v3690_v44 = vld [vmem:[#allocation32_spill] sm:$0xff] }
 0x349   :  { %v2065_v17 = vpop.f32.mrf.mxu0  ;;  %v1447_v53 = vmax.f32 %v1369_v43, 0.0  ;;  %v1489_v43 = vld [vmem:[%s3567_s5 + $0xf0] sm:$0xff] }
 0x34a   :  { %v1424_v5 = vadd.f32 %v2065_v17, %v1200_v63  ;;  %v1440_v63 = vmax.f32 %v1334_v18, 0.0  ;;  %v1455_v9 = vmax.f32 %v1409_v46, 0.0  ;;  %v1384_v46 = vadd.f32 %v2053_v26, %v1160_v56 }
 0x34b   :  { %v1418_v50 = vpop.f32.mrf.mxu0  ;;  %v1452_v60 = vmax.f32 %v1394_v15, 0.0  ;;  %v1449_v26 = vmax.f32 %v1379_v10, 0.0  ;;  %v1433_v22 = vmax.f32 %v1299_v25, 0.0  ;;  %v1430_v17 = vmax.f32 %v1284_v45, 0.0  ;;  %v1467_v15 = vld [vmem:[%s3567_s5 + $0x40] sm:$0xff]  ;;  %v1481_v10 = vld [vmem:[%s3567_s5 + $0xb0] sm:$0xff] }
 0x34c   :  { %v1419_v24 = vadd.f32 %v1418_v50, %v1195_v54  ;;  %v1458_v42 = vmax.f32 %v1424_v5, 0.0  ;;  %v1140_v54 = vpop.permute.xlu0 %1139  ;;  %v1045_v31 = vpop.permute.xlu1 %1044  ;;  %v3689_v5 = vld [vmem:[#allocation33_spill] sm:$0xff]  ;;  %v1483_v25 = vld [vmem:[%s3567_s5 + $0xc0] sm:$0xff] }
 0x34d   :  { %v1364_v12 = vadd.f32 %v3398_v52, %v1140_v54  ;;  %v3688_v52 = vld [vmem:[#allocation22_spill] sm:$0xff]  ;;  %v1463_v54 = vld [vmem:[%s3567_s5 + $0x20] sm:$0xff] }
 0x34e   :  { %v1457_v27 = vmax.f32 %v1419_v24, 0.0  ;;  %1889 = vmatprep.subr.mxu1 %v1458_v42  ;;  %v1274_v37 = vadd.f32 %v3688_v52, %v1050_v1  ;;  %v1269_v24 = vadd.f32 %v3690_v44, %v1045_v31  ;;  %v1429_v42 = vmax.f32 %v1279_v34, 0.0 }
 0x34f   :  { %1890 = vmatpush3.msra.mxu1 %v1442_v57  ;;  %v1446_v28 = vmax.f32 %v1364_v12, 0.0 }
 0x350   :  { %1891 = vmatprep.subr.mxu1 %v1457_v27  ;;  %v1453_v27 = vmax.f32 %v1399_v6, 0.0  ;;  %v1135_v61 = vpop.permute.xlu0 %1134  ;;  %v1428_v18 = vmax.f32 %v1274_v37, 0.0  ;;  %v1427_v38 = vmax.f32 %v1269_v24, 0.0  ;;  %v1461_v6 = vld [vmem:[%s3567_s5 + $0x10] sm:$0xff] }
 0x351   :  { %1892 = vmatpush3.msra.mxu1 %v1441_v36  ;;  %v1451_v36 = vmax.f32 %v1389_v39, 0.0  ;;  %v1359_v58 = vadd.f32 %v3685_v41, %v1135_v61  ;;  %v1471_v39 = vld [vmem:[%s3567_s5 + $0x60] sm:$0xff]  ;;  %v1477_v61 = vld [vmem:[%s3567_s5 + $0x90] sm:$0xff] }
 0x352   :  { %1893 = vmatprep.subr.mxu1 %v1456_v30  ;;  %v1450_v30 = vmax.f32 %v1384_v46, 0.0  ;;  %v1475_v46 = vld [vmem:[%s3567_s5 + $0x80] sm:$0xff] }
 0x353   :  { %1894 = vmatpush3.msra.mxu1 %v1440_v63  ;;  %v1445_v50 = vmax.f32 %v1359_v58, 0.0  ;;  %v1462_v63 = vld [vmem:[%s3567_s5 + $0x18] sm:$0xff] }
 0x354   :  { %1895 = vmatprep.subr.mxu1 %v1455_v9  ;;  %v1130_v56 = vpop.permute.xlu0 %1129  ;;  %v1464_v9 = vld [vmem:[%s3567_s5 + $0x28] sm:$0xff] }
 0x355   :  { %1896 = vmatpush3.msra.mxu1 %v1439_v11  ;;  %v1354_v35 = vadd.f32 %v3687_v19, %v1130_v56  ;;  %v1465_v11 = vld [vmem:[%s3567_s5 + $0x30] sm:$0xff] }
 0x356   :  { %1897 = vmatprep.subr.mxu1 %v1454_v55  ;;  %v1470_v55 = vld [vmem:[%s3567_s5 + $0x58] sm:$0xff] }
 0x357   :  { %1898 = vmatpush3.msra.mxu1 %v1438_v33  ;;  %v1444_v14 = vmax.f32 %v1354_v35, 0.0  ;;  %v1472_v33 = vld [vmem:[%s3567_s5 + $0x68] sm:$0xff] }
 0x358   :  { %1899 = vmatprep.subr.mxu1 %v1453_v27  ;;  %v1125_v20 = vpop.permute.xlu0 %1124  ;;  %v1474_v27 = vld [vmem:[%s3567_s5 + $0x78] sm:$0xff] }
 0x359   :  { %1900 = vmatpush3.msra.mxu1 %v1437_v2  ;;  %v1349_v4 = vadd.f32 %v3689_v5, %v1125_v20  ;;  %v1476_v2 = vld [vmem:[%s3567_s5 + $0x88] sm:$0xff] }
 0x35a   :  { %1901 = vmatprep.subr.mxu1 %v1452_v60  ;;  %v1478_v60 = vld [vmem:[%s3567_s5 + $0x98] sm:$0xff] }
 0x35b   :  { %1902 = vmatpush3.msra.mxu1 %v1436_v49  ;;  %v1443_v57 = vmax.f32 %v1349_v4, 0.0  ;;  %v1479_v49 = vld [vmem:[%s3567_s5 + $0xa0] sm:$0xff] }
 0x35c   :  { %1903 = vmatprep.subr.mxu1 %v1451_v36  ;;  %v1484_v36 = vld [vmem:[%s3567_s5 + $0xc8] sm:$0xff] }
 0x35d   :  { %1904 = vmatpush3.msra.mxu1 %v1435_v13  ;;  %v1486_v13 = vld [vmem:[%s3567_s5 + $0xd8] sm:$0xff] }
 0x35e   :  { %1905 = vmatprep.subr.mxu1 %v1450_v30  ;;  %v1488_v30 = vld [vmem:[%s3567_s5 + $0xe8] sm:$0xff] }
 0x35f   :  { %1906 = vmatpush3.msra.mxu1 %v1434_v16  ;;  %v1490_v16 = vld [vmem:[%s3567_s5 + $0xf8] sm:$0xff] }
 0x360   :  { %1907 = vmatprep.subr.mxu1 %v1449_v26  ;;  %v2235_v26 = vmov 0.0  }
 0x361   :  { %1908 = vmatpush3.msra.mxu1 %v1433_v22  ;;  %2066 = vmatprep.subr.mxu0 %v2235_v26 }
 0x362   :  { %1909 = vmatprep.subr.mxu1 %v1448_v59  ;;  %2098 = vmatprep.mubr.msk.f32.mxu0 %vm2236_vm0, %v2235_v26 }
 0x363   :  { %1910 = vmatpush3.msra.mxu1 %v1432_v29 }
 0x364   :  { %1911 = vmatprep.subr.mxu1 %v1447_v53 }
 0x365   :  { %1912 = vmatpush3.msra.mxu1 %v1431_v51 }
 0x366   :  { %1913 = vmatprep.subr.mxu1 %v1446_v28 }
 0x367   :  { %1914 = vmatpush3.msra.mxu1 %v1430_v17 }
 0x368   :  { %1915 = vmatprep.subr.mxu1 %v1445_v50 }
 0x369   :  { %1916 = vmatpush3.msra.mxu1 %v1429_v42 }
 0x36a   :  { %1917 = vmatprep.subr.mxu1 %v1444_v14 }
 0x36b   :  { %1918 = vmatpush3.msra.mxu1 %v1428_v18  ;;  %v1585_v18 = vpop.permute.xlu0 %1584 }
 0x36c   :  { %1919 = vmatprep.subr.mxu1 %v1443_v57 }
 0x36d   :  { %1920 = vmatpush3.msra.mxu1 %v1427_v38  ;;  %v1580_v38 = vpop.permute.xlu1 %1579 }
 0x36e   :  { %1652 = vmatmul.mubr.f32.vlgmr.msra.gmra.mxu1 %v1459_v23 }
 0x36f   :  { %1656 = vmatprep.mubr.f32.mxu1 %v1462_v63 }
 0x372   :  { %1657 = vmatmul.mubr.f32.gmra.mxu1 %v1461_v6  ;;  %v1575_v6 = vpop.permute.xlu0 %1574 }
 0x373   :  { %1661 = vmatprep.mubr.f32.mxu1 %v1464_v9 }
 0x376   :  { %1662 = vmatmul.mubr.f32.gmra.mxu1 %v1463_v54  ;;  %v1570_v54 = vpop.permute.xlu1 %1569 }
 0x377   :  { %1666 = vmatprep.mubr.f32.mxu1 %v1466_v32 }
 0x37a   :  { %1667 = vmatmul.mubr.f32.gmra.mxu1 %v1465_v11 }
 0x37b   :  { %1671 = vmatprep.mubr.f32.mxu1 %v1468_v48  ;;  %v1565_v48 = vpop.permute.xlu0 %1564 }
 0x37e   :  { %1672 = vmatmul.mubr.f32.gmra.mxu1 %v1467_v15 }
 0x37f   :  { %1676 = vmatprep.mubr.f32.mxu1 %v1470_v55 }
 0x382   :  { %1677 = vmatmul.mubr.f32.gmra.mxu1 %v1469_v47  ;;  %v1560_v47 = vpop.permute.xlu1 %1559 }
 0x383   :  { %1681 = vmatprep.mubr.f32.mxu1 %v1472_v33 }
 0x386   :  { %1682 = vmatmul.mubr.f32.gmra.mxu1 %v1471_v39 }
 0x387   :  { %1686 = vmatprep.mubr.f32.mxu1 %v1474_v27 }
 0x38a   :  { %1687 = vmatmul.mubr.f32.gmra.mxu1 %v1473_v8 }
 0x38b   :  { %1691 = vmatprep.mubr.f32.mxu1 %v1476_v2 }
 0x38e   :  { %1692 = vmatmul.mubr.f32.gmra.mxu1 %v1475_v46 }
 0x38f   :  { %1696 = vmatprep.mubr.f32.mxu1 %v1478_v60  ;;  %v1555_v60 = vpop.permute.xlu0 %1554 }
 0x392   :  { %1697 = vmatmul.mubr.f32.gmra.mxu1 %v1477_v61 }
 0x393   :  { %1701 = vmatprep.mubr.f32.mxu1 %v1480_v21 }
 0x396   :  { %1702 = vmatmul.mubr.f32.gmra.mxu1 %v1479_v49 }
 0x397   :  { %1706 = vmatprep.mubr.f32.mxu1 %v1482_v3  ;;  %v1550_v3 = vpop.permute.xlu1 %1549 }
 0x39a   :  { %1707 = vmatmul.mubr.f32.gmra.mxu1 %v1481_v10 }
 0x39b   :  { %1711 = vmatprep.mubr.f32.mxu1 %v1484_v36 }
 0x39e   :  { %1712 = vmatmul.mubr.f32.gmra.mxu1 %v1483_v25 }
 0x39f   :  { %1716 = vmatprep.mubr.f32.mxu1 %v1486_v13 }
 0x3a2   :  { %1717 = vmatmul.mubr.f32.gmra.mxu1 %v1485_v62 }
 0x3a3   :  { %1721 = vmatprep.mubr.f32.mxu1 %v1488_v30 }
 0x3a6   :  { %1722 = vmatmul.mubr.f32.gmra.mxu1 %v1487_v40  ;;  %v1545_v40 = vpop.permute.xlu0 %1544 }
 0x3a7   :  { %1726 = vmatprep.mubr.f32.mxu1 %v1490_v16 }
 0x3aa   :  { %1727 = vmatmul.mubr.f32.gmra.mxu1 %v1489_v43 }
 0x42e   :  { %v1921_v56 = vpop.f32.mrf.mxu1 }
 0x430   :  { %v1922_v0 = vpop.f32.mrf.mxu1 }
 0x431   :  { %v3520_v22 = vadd.f32 %v1922_v0, %v1921_v56  ;;  %v1540_v0 = vpop.permute.xlu1 %1539 }
 0x432   :  { %v1924_v1 = vpop.f32.mrf.mxu1 }
 0x434   :  { %v1925_v12 = vpop.f32.mrf.mxu1 }
 0x435   :  { %v3522_v59 = vadd.f32 %v1925_v12, %v1924_v1 }
 0x436   :  { %v1927_v45 = vpop.f32.mrf.mxu1 }
 0x438   :  { %v1928_v29 = vpop.f32.mrf.mxu1 }
 0x439   :  { %v3524_v41 = vadd.f32 %v1928_v29, %v1927_v45 }
 0x43a   :  { %v1930_v58 = vpop.f32.mrf.mxu1 }
 0x43c   :  { %v1931_v53 = vpop.f32.mrf.mxu1 }
 0x43d   :  { %v3526_v7 = vadd.f32 %v1931_v53, %v1930_v58 }
 0x43e   :  { %v1933_v34 = vpop.f32.mrf.mxu1 }
 0x440   :  { %v1934_v51 = vpop.f32.mrf.mxu1 }
 0x441   :  { %v3528_v19 = vadd.f32 %v1934_v51, %v1933_v34  ;;  %v1535_v34 = vpop.permute.xlu0 %1534 }
 0x442   :  { %v3530_v35 = vpop.f32.mrf.mxu1 }
 0x444   :  { %v3532_v28 = vpop.f32.mrf.mxu1 }
 0x445   :  { %v1938_v51 = vadd.f32 %v3532_v28, %v3530_v35 }
 0x446   :  { %v1939_v20 = vpop.f32.mrf.mxu1 }
 0x448   :  { %v1940_v52 = vpop.f32.mrf.mxu1 }
 0x449   :  { %v1941_v29 = vadd.f32 %v1940_v52, %v1939_v20  ;;  %v1679_v20 = vadd.f32 %v1938_v51, %v1535_v34 }
 0x44a   :  { %v1942_v37 = vpop.f32.mrf.mxu1 }
 0x44c   :  { %v1943_v17 = vpop.f32.mrf.mxu1 }
 0x44d   :  { %v1944_v1 = vadd.f32 %v1943_v17, %v1942_v37  ;;  %v1684_v37 = vadd.f32 %v1941_v29, %v1540_v0 }
 0x44e   :  { %v1945_v31 = vpop.f32.mrf.mxu1 }
 0x44f   :  { %v1738_v35 = vmax.f32 %v1684_v37, 0.0 }
 0x450   :  { %v1946_v5 = vpop.f32.mrf.mxu1 }
 0x451   :  { %v1947_v16 = vadd.f32 %v1946_v5, %v1945_v31  ;;  %v1689_v31 = vadd.f32 %v1944_v1, %v1545_v40 }
 0x452   :  { %v1948_v4 = vpop.f32.mrf.mxu1 }
 0x453   :  { %v1694_v58 = vadd.f32 %v1947_v16, %v1550_v3  ;;  %v1739_v52 = vmax.f32 %v1689_v31, 0.0 }
 0x454   :  { %v1949_v50 = vpop.f32.mrf.mxu1 }
 0x455   :  { %v1950_v13 = vadd.f32 %v1949_v50, %v1948_v4  ;;  %v1530_v4 = vpop.permute.xlu1 %1529  ;;  %v1740_v17 = vmax.f32 %v1694_v58, 0.0  ;;  %v1525_v50 = vpop.permute.xlu0 %1524 }
 0x456   :  { %v1951_v44 = vpop.f32.mrf.mxu1 }
 0x457   :  { %v1699_v12 = vadd.f32 %v1950_v13, %v1555_v60 }
 0x458   :  { %v1952_v24 = vpop.f32.mrf.mxu1 }
 0x459   :  { %v1953_v10 = vadd.f32 %v1952_v24, %v1951_v44  ;;  %v1741_v5 = vmax.f32 %v1699_v12, 0.0  ;;  %v1674_v44 = vadd.f32 %v3528_v19, %v1530_v4  ;;  %v1520_v28 = vpop.permute.xlu1 %1519  ;;  %v1669_v24 = vadd.f32 %v3526_v7, %v1525_v50 }
 0x45a   :  { %v1954_v42 = vpop.f32.mrf.mxu1 }
 0x45b   :  { %v1704_v43 = vadd.f32 %v1953_v10, %v1560_v47 }
 0x45c   :  { %v1955_v14 = vpop.f32.mrf.mxu1 }
 0x45d   :  { %v1956_v61 = vadd.f32 %v1955_v14, %v1954_v42  ;;  %v1742_v53 = vmax.f32 %v1704_v43, 0.0  ;;  %v1737_v42 = vmax.f32 %v1679_v20, 0.0  ;;  %v1664_v14 = vadd.f32 %v3524_v41, %v1520_v28 }
 0x45e   :  { %v1957_v57 = vpop.f32.mrf.mxu1 }
 0x45f   :  { %v1709_v62 = vadd.f32 %v1956_v61, %v1565_v48 }
 0x460   :  { %v1958_v23 = vpop.f32.mrf.mxu1 }
 0x461   :  { %v1959_v8 = vadd.f32 %v1958_v23, %v1957_v57  ;;  %v1743_v45 = vmax.f32 %v1709_v62, 0.0  ;;  %v1515_v57 = vpop.permute.xlu0 %1514  ;;  %v1510_v23 = vpop.permute.xlu1 %1509 }
 0x462   :  { %v1960_v63 = vpop.f32.mrf.mxu1  ;;  %v1659_v19 = vadd.f32 %v3522_v59, %v1515_v57  ;;  %v1654_v7 = vadd.f32 %v3520_v22, %v1510_v23  ;;  %v1748_v59 = vld [vmem:[%s3569_s7] sm:$0xff] }
 0x463   :  { %v1714_v36 = vadd.f32 %v1959_v8, %v1570_v54 }
 0x464   :  { %v1961_v9 = vpop.f32.mrf.mxu1  ;;  %v1732_v41 = vmax.f32 %v1654_v7, 0.0 }
 0x465   :  { %v1962_v39 = vadd.f32 %v1961_v9, %v1960_v63  ;;  %v1744_v56 = vmax.f32 %v1714_v36, 0.0  ;;  %v1734_v63 = vmax.f32 %v1664_v14, 0.0  ;;  %v1753_v22 = vpop.permute.xlu0 %1752 }
 0x466   :  { %v1963_v32 = vpop.f32.mrf.mxu1 }
 0x467   :  { %v1719_v21 = vadd.f32 %v1962_v39, %v1575_v6  ;;  %v1733_v6 = vmax.f32 %v1659_v19, 0.0 }
 0x468   :  { %v1964_v11 = vpop.f32.mrf.mxu1 }
 0x469   :  { %v1965_v55 = vadd.f32 %v1964_v11, %v1963_v32  ;;  %v1745_v30 = vmax.f32 %v1719_v21, 0.0 }
 0x46a   :  { %v1966_v15 = vpop.f32.mrf.mxu1 }
 0x46b   :  { %v1724_v2 = vadd.f32 %v1965_v55, %v1580_v38  ;;  %v1735_v38 = vmax.f32 %v1669_v24, 0.0 }
 0x46c   :  { %v1967_v33 = vpop.f32.mrf.mxu1 }
 0x46d   :  { %v1968_v27 = vadd.f32 %v1967_v33, %v1966_v15  ;;  %v1746_v25 = vmax.f32 %v1724_v2, 0.0 }
 0x46f   :  { %v1729_v46 = vadd.f32 %v1968_v27, %v1585_v18  ;;  %v1736_v18 = vmax.f32 %v1674_v44, 0.0 }
 0x471   :  { %v1747_v49 = vmax.f32 %v1729_v46, 0.0 }
 0x473   :  { %2067 = vmatpush3.msra.mxu0 %v1747_v49 }
 0x474   :  { %2068 = vmatprep.subr.mxu0 %v2235_v26 }
 0x475   :  { %2069 = vmatpush3.msra.mxu0 %v1746_v25 }
 0x476   :  { %2070 = vmatprep.subr.mxu0 %v2235_v26 }
 0x477   :  { %2071 = vmatpush3.msra.mxu0 %v1745_v30 }
 0x478   :  { %2072 = vmatprep.subr.mxu0 %v2235_v26 }
 0x479   :  { %2073 = vmatpush3.msra.mxu0 %v1744_v56 }
 0x47a   :  { %2074 = vmatprep.subr.mxu0 %v2235_v26 }
 0x47b   :  { %2075 = vmatpush3.msra.mxu0 %v1743_v45 }
 0x47c   :  { %2076 = vmatprep.subr.mxu0 %v2235_v26 }
 0x47d   :  { %2077 = vmatpush3.msra.mxu0 %v1742_v53 }
 0x47e   :  { %2078 = vmatprep.subr.mxu0 %v2235_v26 }
 0x47f   :  { %2079 = vmatpush3.msra.mxu0 %v1741_v5 }
 0x480   :  { %2080 = vmatprep.subr.mxu0 %v2235_v26 }
 0x481   :  { %2081 = vmatpush3.msra.mxu0 %v1740_v17 }
 0x482   :  { %2082 = vmatprep.subr.mxu0 %v2235_v26 }
 0x483   :  { %2083 = vmatpush3.msra.mxu0 %v1739_v52 }
 0x484   :  { %2084 = vmatprep.subr.mxu0 %v2235_v26 }
 0x485   :  { %2085 = vmatpush3.msra.mxu0 %v1738_v35 }
 0x486   :  { %2086 = vmatprep.subr.mxu0 %v2235_v26 }
 0x487   :  { %2087 = vmatpush3.msra.mxu0 %v1737_v42 }
 0x488   :  { %2088 = vmatprep.subr.mxu0 %v2235_v26 }
 0x489   :  { %2089 = vmatpush3.msra.mxu0 %v1736_v18 }
 0x48a   :  { %2090 = vmatprep.subr.mxu0 %v2235_v26 }
 0x48b   :  { %2091 = vmatpush3.msra.mxu0 %v1735_v38 }
 0x48c   :  { %2092 = vmatprep.subr.mxu0 %v2235_v26 }
 0x48d   :  { %2093 = vmatpush3.msra.mxu0 %v1734_v63 }
 0x48e   :  { %2094 = vmatprep.subr.mxu0 %v2235_v26 }
 0x48f   :  { %2095 = vmatpush3.msra.mxu0 %v1733_v6 }
 0x490   :  { %2096 = vmatprep.subr.mxu0 %v2235_v26 }
 0x491   :  { %2097 = vmatpush3.msra.mxu0 %v1732_v41 }
 0x492   :  { %2099 = vmatmul.mubr.f32.vlgmr.msra.gmra.mxu0 %v1748_v59 }
 0x552   :  { %v1821_v9 = vpop.f32.mrf.mxu0 }
 0x553   :  { %v1822_v54 = vadd.f32 %v1821_v9, %v1753_v22 }
 0x554   :  { %v2100_v32 = vpop.f32.mrf.mxu0 }
 0x555   :  { %1826 = vst.msk [vmem:[#allocation2] sm:$0xff] %vm1825_vm1, %v1822_v54 }
 0x556   :  { %2216 = shalt.err (!%p2213_p4)
}
 0x557   :  { %1836 = dma.vmem_to_hbm [thread:$0]  %s1834_s24, 128, %s3571_s9, [#allocation3]  }
 0x558   :  { %2225 = dma.done.wait [#allocation3], 128  }
 0x559   :  { %2226 = vsyncadd [#allocation3], 4294967168 }
 0x55a   :  { %1840 = vsyncpa [#allocation3], 1 }

</bundles_post_ra>
